<compile_context>
chip_gen: v7x
topology: tpu7x:2x2x1
jax: 0.10.0
libtpu: 0.0.40
codegen_flags: <defaults>
</compile_context>

<pallas_src>
import functools
import math

import jax
import jax.numpy as jnp
from jax.experimental import pallas as pl
from jax.experimental.pallas import tpu as pltpu


# ------------------------- Fused LSTM + FC kernel -----------------------------
def _fused_lstm_fc_kernel(num_layers, batch, hidden, x_ref, *refs):
    """refs = [w_ih_0, w_hh_0, b_0, ..., w_ih_{L-1}, w_hh_{L-1}, b_{L-1},
               fc_w, fc_b, out_ref, gx_ref, hseq_ref]."""
    n_w = 3 * num_layers
    fc_w_ref = refs[n_w]
    fc_b_ref = refs[n_w + 1]
    out_ref = refs[n_w + 2]
    gx_ref = refs[n_w + 3]        # (T*B, 4H) pre-activation gates scratch
    hseq_ref = refs[n_w + 4]      # (T*B, H)  per-layer hidden-sequence scratch

    B, H = batch, hidden
    T = x_ref.shape[0] // B

    # Lane mask, hoisted out of all loops: lanes [2H, 3H) hold the cell
    # candidate gate 'g' (tanh); lanes for i, f, o use sigmoid.
    lane = jax.lax.broadcasted_iota(jnp.int32, (B, 4 * H), 1)
    g_lane = jnp.logical_and(lane >= 2 * H, lane < 3 * H)

    h = None
    for layer in range(num_layers):
        w_ih = refs[3 * layer][...]        # (D_in, 4H)
        w_hh = refs[3 * layer + 1][...]    # (H, 4H)
        bias = refs[3 * layer + 2][...]    # (1, 4H) == b_ih + b_hh

        # gates_x hoist: one batched MXU matmul over all T time steps, bias
        # folded in, so neither is on the serial recurrence path.
        inp = x_ref[...] if layer == 0 else hseq_ref[...]
        gx_ref[...] = (
            jnp.dot(inp, w_ih, preferred_element_type=jnp.float32) + bias
        )

        h = jnp.zeros((B, H), jnp.float32)
        c = jnp.zeros((B, H), jnp.float32)
        # Fully unrolled time recurrence: per step only h @ W_hh + gate math,
        # all operands resident in VMEM / vregs, static slices only.
        for t in range(T):
            gates = gx_ref[pl.ds(t * B, B), :] + jnp.dot(
                h, w_hh, preferred_element_type=jnp.float32)         # (B, 4H)
            # Lane-dense activation on the full 4H-wide vreg.
            act = jnp.where(g_lane, jnp.tanh(gates), jax.nn.sigmoid(gates))
            i_g = act[:, 0 * H:1 * H]
            f_g = act[:, 1 * H:2 * H]
            g_g = act[:, 2 * H:3 * H]
            o_g = act[:, 3 * H:4 * H]
            c = f_g * c + i_g * g_g
            h = o_g * jnp.tanh(c)
            if layer < num_layers - 1:        # last layer only needs h[T-1]
                hseq_ref[pl.ds(t * B, B), :] = h

    # Final Linear (fused): out = h_T @ W_fc + b_fc  ==  fc(lstm_out[:, -1, :])
    out_ref[...] = (
        jnp.dot(h, fc_w_ref[...], preferred_element_type=jnp.float32)
        + fc_b_ref[...]
    ).astype(out_ref.dtype)


def my_lstm_forward_impl(params, x):
    """x: (B, T, input_size), batch-first like the PyTorch module.
    Returns (B, output_size)."""
    B, T, D_in = x.shape
    layers = params["layers"]
    num_layers = len(layers)
    H = layers[0][1].shape[0]
    O = params["fc_w"].shape[1]

    # Time-major flatten: row t*B + b holds (time t, batch b).
    x2d = jnp.transpose(x, (1, 0, 2)).reshape(T * B, D_in)

    flat_weights = []
    for (w_ih, w_hh, bias) in layers:
        flat_weights += [w_ih, w_hh, bias]
    flat_weights += [params["fc_w"], params["fc_b"]]

    kernel = functools.partial(_fused_lstm_fc_kernel, num_layers, B, H)

    # All block shapes equal the full array dims (satisfies the (8,128) rule).
    in_specs = [pl.BlockSpec(x2d.shape, lambda i: (0, 0))]
    in_specs += [pl.BlockSpec(w.shape, lambda i: (0, 0)) for w in flat_weights]

    return pl.pallas_call(
        kernel,
        out_shape=jax.ShapeDtypeStruct((B, O), x.dtype),
        grid_spec=pltpu.PrefetchScalarGridSpec(
            num_scalar_prefetch=0,
            grid=(1,),                      # single launch; whole net in VMEM
            in_specs=in_specs,
            out_specs=pl.BlockSpec((B, O), lambda i: (0, 0)),
            scratch_shapes=[
                pltpu.VMEM((T * B, 4 * H), jnp.float32),   # gates_x
                pltpu.VMEM((T * B, H), jnp.float32),       # hidden sequence
            ],
        ),
        compiler_params=pltpu.CompilerParams(
            dimension_semantics=("arbitrary",),
        ),
    )(x2d, *flat_weights)


my_lstm_forward = jax.jit(my_lstm_forward_impl)


# ------------------------------ Parameter init --------------------------------
def _xavier_uniform(key, shape):
    # shape interpreted as (fan_out, fan_in) like the PyTorch weight layout
    fan_out, fan_in = shape
    bound = math.sqrt(6.0 / (fan_in + fan_out))
    return jax.random.uniform(key, shape, jnp.float32, -bound, bound)


def _orthogonal(key, shape):
    rows, cols = shape
    n = max(rows, cols)
    a = jax.random.normal(key, (n, n), jnp.float32)
    q, r = jnp.linalg.qr(a)
    q = q * jnp.sign(jnp.diag(r))[None, :]
    return q[:rows, :cols]


def init_params(key, input_size, hidden_size, output_size, num_layers):
    params = {"layers": []}
    for layer in range(num_layers):
        d_in = input_size if layer == 0 else hidden_size
        key, k1, k2 = jax.random.split(key, 3)
        w_ih = _xavier_uniform(k1, (4 * hidden_size, d_in)).T        # (d_in, 4H)
        w_hh = _orthogonal(k2, (4 * hidden_size, hidden_size)).T     # (H, 4H)
        bias = jnp.zeros((1, 4 * hidden_size), jnp.float32)          # b_ih + b_hh
        params["layers"].append((w_ih, w_hh, bias))
    key, kf = jax.random.split(key)
    params["fc_w"] = _xavier_uniform(kf, (output_size, hidden_size)).T  # (H, O)
    params["fc_b"] = jnp.zeros((1, output_size), jnp.float32)
    return params


# TODO(synk): inter-layer dropout (dropout > 0, training mode) is not implemented.

if __name__ == "__main__":
    input_size = 16
    hidden_size = 32
    output_size = 8
    num_layers = 2
    batch = 2
    seq = 8

    key = jax.random.PRNGKey(0)
    key, kx, kp = jax.random.split(key, 3)
    x = jax.random.normal(kx, (batch, seq, input_size), jnp.float32)
    params = init_params(kp, input_size, hidden_size, output_size, num_layers)

    out = my_lstm_forward(params, x)
    jax.block_until_ready(out)
    assert out.shape == (batch, output_size), out.shape
    print("KERNEL_OK")
</pallas_src>

<mosaic_0001>
module attributes {stable_mosaic.version = 11 : i64} {
  func.func @_fused_lstm_fc_kernel(%arg0: i32, %arg1: memref<16x16xf32, #tpu.memory_space<vmem>>, %arg2: memref<16x128xf32, #tpu.memory_space<vmem>>, %arg3: memref<32x128xf32, #tpu.memory_space<vmem>>, %arg4: memref<1x128xf32, #tpu.memory_space<vmem>>, %arg5: memref<32x128xf32, #tpu.memory_space<vmem>>, %arg6: memref<32x128xf32, #tpu.memory_space<vmem>>, %arg7: memref<1x128xf32, #tpu.memory_space<vmem>>, %arg8: memref<32x8xf32, #tpu.memory_space<vmem>>, %arg9: memref<1x8xf32, #tpu.memory_space<vmem>>, %arg10: memref<2x8xf32, #tpu.memory_space<vmem>>, %arg11: memref<16x128xf32, #tpu.memory_space<vmem>>, %arg12: memref<16x32xf32, #tpu.memory_space<vmem>>) attributes {dimension_semantics = [#tpu.dimension_semantics<arbitrary>], iteration_bounds = array<i64: 1>, scalar_prefetch = 0 : i64, scratch_operands = 2 : i64, tpu.core_type = #tpu.core_type<tc>, window_params = [{pipeline_mode = #tpu.pipeline_mode<synchronous>, transform_indices = @transform_0, window_bounds = array<i64: 16, 16>}, {pipeline_mode = #tpu.pipeline_mode<synchronous>, transform_indices = @transform_1, window_bounds = array<i64: 16, 128>}, {pipeline_mode = #tpu.pipeline_mode<synchronous>, transform_indices = @transform_2, window_bounds = array<i64: 32, 128>}, {pipeline_mode = #tpu.pipeline_mode<synchronous>, transform_indices = @transform_3, window_bounds = array<i64: 1, 128>}, {pipeline_mode = #tpu.pipeline_mode<synchronous>, transform_indices = @transform_4, window_bounds = array<i64: 32, 128>}, {pipeline_mode = #tpu.pipeline_mode<synchronous>, transform_indices = @transform_5, window_bounds = array<i64: 32, 128>}, {pipeline_mode = #tpu.pipeline_mode<synchronous>, transform_indices = @transform_6, window_bounds = array<i64: 1, 128>}, {pipeline_mode = #tpu.pipeline_mode<synchronous>, transform_indices = @transform_7, window_bounds = array<i64: 32, 8>}, {pipeline_mode = #tpu.pipeline_mode<synchronous>, transform_indices = @transform_8, window_bounds = array<i64: 1, 8>}, {pipeline_mode = #tpu.pipeline_mode<synchronous>, transform_indices = @transform_9, window_bounds = array<i64: 2, 8>}]} {
    %0 = tpu.iota {dimensions = array<i32: 1>} : vector<2x128xi32>
    %c64_i32 = arith.constant 64 : i32
    %1 = vector.broadcast %c64_i32 : i32 to vector<2x128xi32>
    %2 = arith.cmpi sge, %0, %1 : vector<2x128xi32>
    %c96_i32 = arith.constant 96 : i32
    %3 = vector.broadcast %c96_i32 : i32 to vector<2x128xi32>
    %4 = arith.cmpi slt, %0, %3 : vector<2x128xi32>
    %5 = arith.andi %2, %4 : vector<2x128xi1>
    %c0 = arith.constant 0 : index
    %c0_0 = arith.constant 0 : index
    %6 = vector.load %arg2[%c0, %c0_0] : memref<16x128xf32, #tpu.memory_space<vmem>>, vector<16x128xf32>
    %c0_1 = arith.constant 0 : index
    %c0_2 = arith.constant 0 : index
    %7 = vector.load %arg3[%c0_1, %c0_2] : memref<32x128xf32, #tpu.memory_space<vmem>>, vector<32x128xf32>
    %c0_3 = arith.constant 0 : index
    %c0_4 = arith.constant 0 : index
    %8 = vector.load %arg4[%c0_3, %c0_4] : memref<1x128xf32, #tpu.memory_space<vmem>>, vector<1x128xf32>
    %c0_5 = arith.constant 0 : index
    %c0_6 = arith.constant 0 : index
    %9 = vector.load %arg1[%c0_5, %c0_6] : memref<16x16xf32, #tpu.memory_space<vmem>>, vector<16x16xf32>
    %cst = arith.constant dense<0.000000e+00> : vector<16x128xf32>
    %10 = tpu.matmul %9, %6, %cst {dimension_numbers = #tpu.dot_dimension_numbers<[1], [0], [0], [1], [0, 0, 1, 1], [], []>} : vector<16x16xf32>, vector<16x128xf32>, vector<16x128xf32> -> vector<16x128xf32>
    %11 = vector.broadcast %8 : vector<1x128xf32> to vector<16x128xf32>
    %12 = arith.addf %10, %11 : vector<16x128xf32>
    %c0_7 = arith.constant 0 : index
    %c0_8 = arith.constant 0 : index
    %13 = vector.load %arg11[%c0_7, %c0_8] : memref<16x128xf32, #tpu.memory_space<vmem>>, vector<16x128xf32>
    tpu.vector_store %arg11[%c0_7, %c0_8], %12 {strides = array<i32>} : memref<16x128xf32, #tpu.memory_space<vmem>>, vector<16x128xf32>,
    %cst_9 = arith.constant 0.000000e+00 : f32
    %14 = vector.broadcast %cst_9 : f32 to vector<2x32xf32>
    %cst_10 = arith.constant 0.000000e+00 : f32
    %15 = vector.broadcast %cst_10 : f32 to vector<2x32xf32>
    %c0_11 = arith.constant 0 : index
    %c0_12 = arith.constant 0 : index
    %16 = vector.load %arg11[%c0_11, %c0_12] : memref<16x128xf32, #tpu.memory_space<vmem>>, vector<2x128xf32>
    %cst_13 = arith.constant dense<0.000000e+00> : vector<2x128xf32>
    %17 = tpu.matmul %14, %7, %cst_13 {dimension_numbers = #tpu.dot_dimension_numbers<[1], [0], [0], [1], [0, 0, 1, 1], [], []>} : vector<2x32xf32>, vector<32x128xf32>, vector<2x128xf32> -> vector<2x128xf32>
    %18 = arith.addf %16, %17 : vector<2x128xf32>
    %19 = math.tanh %18 : vector<2x128xf32>
    %20 = arith.negf %18 : vector<2x128xf32>
    %21 = math.exp %20 : vector<2x128xf32>
    %cst_14 = arith.constant 1.000000e+00 : f32
    %22 = vector.broadcast %cst_14 : f32 to vector<2x128xf32>
    %23 = arith.addf %22, %21 : vector<2x128xf32>
    %24 = arith.divf %22, %23 : vector<2x128xf32>
    %25 = arith.select %5, %19, %24 : vector<2x128xi1>, vector<2x128xf32>
    %26 = vector.extract_strided_slice %25 {offsets = [0, 0], sizes = [2, 32], strides = [1, 1]} : vector<2x128xf32> to vector<2x32xf32>
    %27 = vector.extract_strided_slice %25 {offsets = [0, 32], sizes = [2, 32], strides = [1, 1]} : vector<2x128xf32> to vector<2x32xf32>
    %28 = vector.extract_strided_slice %25 {offsets = [0, 64], sizes = [2, 32], strides = [1, 1]} : vector<2x128xf32> to vector<2x32xf32>
    %29 = vector.extract_strided_slice %25 {offsets = [0, 96], sizes = [2, 32], strides = [1, 1]} : vector<2x128xf32> to vector<2x32xf32>
    %30 = arith.mulf %27, %15 : vector<2x32xf32>
    %31 = arith.mulf %26, %28 : vector<2x32xf32>
    %32 = arith.addf %30, %31 : vector<2x32xf32>
    %33 = math.tanh %32 : vector<2x32xf32>
    %34 = arith.mulf %29, %33 : vector<2x32xf32>
    %c0_15 = arith.constant 0 : index
    %c0_16 = arith.constant 0 : index
    %35 = vector.load %arg12[%c0_15, %c0_16] : memref<16x32xf32, #tpu.memory_space<vmem>>, vector<2x32xf32>
    tpu.vector_store %arg12[%c0_15, %c0_16], %34 {strides = array<i32>} : memref<16x32xf32, #tpu.memory_space<vmem>>, vector<2x32xf32>,
    %c2 = arith.constant 2 : index
    %c0_17 = arith.constant 0 : index
    %36 = vector.load %arg11[%c2, %c0_17] : memref<16x128xf32, #tpu.memory_space<vmem>>, vector<2x128xf32>
    %cst_18 = arith.constant dense<0.000000e+00> : vector<2x128xf32>
    %37 = tpu.matmul %34, %7, %cst_18 {dimension_numbers = #tpu.dot_dimension_numbers<[1], [0], [0], [1], [0, 0, 1, 1], [], []>} : vector<2x32xf32>, vector<32x128xf32>, vector<2x128xf32> -> vector<2x128xf32>
    %38 = arith.addf %36, %37 : vector<2x128xf32>
    %39 = math.tanh %38 : vector<2x128xf32>
    %40 = arith.negf %38 : vector<2x128xf32>
    %41 = math.exp %40 : vector<2x128xf32>
    %cst_19 = arith.constant 1.000000e+00 : f32
    %42 = vector.broadcast %cst_19 : f32 to vector<2x128xf32>
    %43 = arith.addf %42, %41 : vector<2x128xf32>
    %44 = arith.divf %42, %43 : vector<2x128xf32>
    %45 = arith.select %5, %39, %44 : vector<2x128xi1>, vector<2x128xf32>
    %46 = vector.extract_strided_slice %45 {offsets = [0, 0], sizes = [2, 32], strides = [1, 1]} : vector<2x128xf32> to vector<2x32xf32>
    %47 = vector.extract_strided_slice %45 {offsets = [0, 32], sizes = [2, 32], strides = [1, 1]} : vector<2x128xf32> to vector<2x32xf32>
    %48 = vector.extract_strided_slice %45 {offsets = [0, 64], sizes = [2, 32], strides = [1, 1]} : vector<2x128xf32> to vector<2x32xf32>
    %49 = vector.extract_strided_slice %45 {offsets = [0, 96], sizes = [2, 32], strides = [1, 1]} : vector<2x128xf32> to vector<2x32xf32>
    %50 = arith.mulf %47, %32 : vector<2x32xf32>
    %51 = arith.mulf %46, %48 : vector<2x32xf32>
    %52 = arith.addf %50, %51 : vector<2x32xf32>
    %53 = math.tanh %52 : vector<2x32xf32>
    %54 = arith.mulf %49, %53 : vector<2x32xf32>
    %c2_20 = arith.constant 2 : index
    %c0_21 = arith.constant 0 : index
    %55 = vector.load %arg12[%c2_20, %c0_21] : memref<16x32xf32, #tpu.memory_space<vmem>>, vector<2x32xf32>
    tpu.vector_store %arg12[%c2_20, %c0_21], %54 {strides = array<i32>} : memref<16x32xf32, #tpu.memory_space<vmem>>, vector<2x32xf32>,
    %c4 = arith.constant 4 : index
    %c0_22 = arith.constant 0 : index
    %56 = vector.load %arg11[%c4, %c0_22] : memref<16x128xf32, #tpu.memory_space<vmem>>, vector<2x128xf32>
    %cst_23 = arith.constant dense<0.000000e+00> : vector<2x128xf32>
    %57 = tpu.matmul %54, %7, %cst_23 {dimension_numbers = #tpu.dot_dimension_numbers<[1], [0], [0], [1], [0, 0, 1, 1], [], []>} : vector<2x32xf32>, vector<32x128xf32>, vector<2x128xf32> -> vector<2x128xf32>
    %58 = arith.addf %56, %57 : vector<2x128xf32>
    %59 = math.tanh %58 : vector<2x128xf32>
    %60 = arith.negf %58 : vector<2x128xf32>
    %61 = math.exp %60 : vector<2x128xf32>
    %cst_24 = arith.constant 1.000000e+00 : f32
    %62 = vector.broadcast %cst_24 : f32 to vector<2x128xf32>
    %63 = arith.addf %62, %61 : vector<2x128xf32>
    %64 = arith.divf %62, %63 : vector<2x128xf32>
    %65 = arith.select %5, %59, %64 : vector<2x128xi1>, vector<2x128xf32>
    %66 = vector.extract_strided_slice %65 {offsets = [0, 0], sizes = [2, 32], strides = [1, 1]} : vector<2x128xf32> to vector<2x32xf32>
    %67 = vector.extract_strided_slice %65 {offsets = [0, 32], sizes = [2, 32], strides = [1, 1]} : vector<2x128xf32> to vector<2x32xf32>
    %68 = vector.extract_strided_slice %65 {offsets = [0, 64], sizes = [2, 32], strides = [1, 1]} : vector<2x128xf32> to vector<2x32xf32>
    %69 = vector.extract_strided_slice %65 {offsets = [0, 96], sizes = [2, 32], strides = [1, 1]} : vector<2x128xf32> to vector<2x32xf32>
    %70 = arith.mulf %67, %52 : vector<2x32xf32>
    %71 = arith.mulf %66, %68 : vector<2x32xf32>
    %72 = arith.addf %70, %71 : vector<2x32xf32>
    %73 = math.tanh %72 : vector<2x32xf32>
    %74 = arith.mulf %69, %73 : vector<2x32xf32>
    %c4_25 = arith.constant 4 : index
    %c0_26 = arith.constant 0 : index
    %75 = vector.load %arg12[%c4_25, %c0_26] : memref<16x32xf32, #tpu.memory_space<vmem>>, vector<2x32xf32>
    tpu.vector_store %arg12[%c4_25, %c0_26], %74 {strides = array<i32>} : memref<16x32xf32, #tpu.memory_space<vmem>>, vector<2x32xf32>,
    %c6 = arith.constant 6 : index
    %c0_27 = arith.constant 0 : index
    %76 = vector.load %arg11[%c6, %c0_27] : memref<16x128xf32, #tpu.memory_space<vmem>>, vector<2x128xf32>
    %cst_28 = arith.constant dense<0.000000e+00> : vector<2x128xf32>
    %77 = tpu.matmul %74, %7, %cst_28 {dimension_numbers = #tpu.dot_dimension_numbers<[1], [0], [0], [1], [0, 0, 1, 1], [], []>} : vector<2x32xf32>, vector<32x128xf32>, vector<2x128xf32> -> vector<2x128xf32>
    %78 = arith.addf %76, %77 : vector<2x128xf32>
    %79 = math.tanh %78 : vector<2x128xf32>
    %80 = arith.negf %78 : vector<2x128xf32>
    %81 = math.exp %80 : vector<2x128xf32>
    %cst_29 = arith.constant 1.000000e+00 : f32
    %82 = vector.broadcast %cst_29 : f32 to vector<2x128xf32>
    %83 = arith.addf %82, %81 : vector<2x128xf32>
    %84 = arith.divf %82, %83 : vector<2x128xf32>
    %85 = arith.select %5, %79, %84 : vector<2x128xi1>, vector<2x128xf32>
    %86 = vector.extract_strided_slice %85 {offsets = [0, 0], sizes = [2, 32], strides = [1, 1]} : vector<2x128xf32> to vector<2x32xf32>
    %87 = vector.extract_strided_slice %85 {offsets = [0, 32], sizes = [2, 32], strides = [1, 1]} : vector<2x128xf32> to vector<2x32xf32>
    %88 = vector.extract_strided_slice %85 {offsets = [0, 64], sizes = [2, 32], strides = [1, 1]} : vector<2x128xf32> to vector<2x32xf32>
    %89 = vector.extract_strided_slice %85 {offsets = [0, 96], sizes = [2, 32], strides = [1, 1]} : vector<2x128xf32> to vector<2x32xf32>
    %90 = arith.mulf %87, %72 : vector<2x32xf32>
    %91 = arith.mulf %86, %88 : vector<2x32xf32>
    %92 = arith.addf %90, %91 : vector<2x32xf32>
    %93 = math.tanh %92 : vector<2x32xf32>
    %94 = arith.mulf %89, %93 : vector<2x32xf32>
    %c6_30 = arith.constant 6 : index
    %c0_31 = arith.constant 0 : index
    %95 = vector.load %arg12[%c6_30, %c0_31] : memref<16x32xf32, #tpu.memory_space<vmem>>, vector<2x32xf32>
    tpu.vector_store %arg12[%c6_30, %c0_31], %94 {strides = array<i32>} : memref<16x32xf32, #tpu.memory_space<vmem>>, vector<2x32xf32>,
    %c8 = arith.constant 8 : index
    %c0_32 = arith.constant 0 : index
    %96 = vector.load %arg11[%c8, %c0_32] : memref<16x128xf32, #tpu.memory_space<vmem>>, vector<2x128xf32>
    %cst_33 = arith.constant dense<0.000000e+00> : vector<2x128xf32>
    %97 = tpu.matmul %94, %7, %cst_33 {dimension_numbers = #tpu.dot_dimension_numbers<[1], [0], [0], [1], [0, 0, 1, 1], [], []>} : vector<2x32xf32>, vector<32x128xf32>, vector<2x128xf32> -> vector<2x128xf32>
    %98 = arith.addf %96, %97 : vector<2x128xf32>
    %99 = math.tanh %98 : vector<2x128xf32>
    %100 = arith.negf %98 : vector<2x128xf32>
    %101 = math.exp %100 : vector<2x128xf32>
    %cst_34 = arith.constant 1.000000e+00 : f32
    %102 = vector.broadcast %cst_34 : f32 to vector<2x128xf32>
    %103 = arith.addf %102, %101 : vector<2x128xf32>
    %104 = arith.divf %102, %103 : vector<2x128xf32>
    %105 = arith.select %5, %99, %104 : vector<2x128xi1>, vector<2x128xf32>
    %106 = vector.extract_strided_slice %105 {offsets = [0, 0], sizes = [2, 32], strides = [1, 1]} : vector<2x128xf32> to vector<2x32xf32>
    %107 = vector.extract_strided_slice %105 {offsets = [0, 32], sizes = [2, 32], strides = [1, 1]} : vector<2x128xf32> to vector<2x32xf32>
    %108 = vector.extract_strided_slice %105 {offsets = [0, 64], sizes = [2, 32], strides = [1, 1]} : vector<2x128xf32> to vector<2x32xf32>
    %109 = vector.extract_strided_slice %105 {offsets = [0, 96], sizes = [2, 32], strides = [1, 1]} : vector<2x128xf32> to vector<2x32xf32>
    %110 = arith.mulf %107, %92 : vector<2x32xf32>
    %111 = arith.mulf %106, %108 : vector<2x32xf32>
    %112 = arith.addf %110, %111 : vector<2x32xf32>
    %113 = math.tanh %112 : vector<2x32xf32>
    %114 = arith.mulf %109, %113 : vector<2x32xf32>
    %c8_35 = arith.constant 8 : index
    %c0_36 = arith.constant 0 : index
    %115 = vector.load %arg12[%c8_35, %c0_36] : memref<16x32xf32, #tpu.memory_space<vmem>>, vector<2x32xf32>
    tpu.vector_store %arg12[%c8_35, %c0_36], %114 {strides = array<i32>} : memref<16x32xf32, #tpu.memory_space<vmem>>, vector<2x32xf32>,
    %c10 = arith.constant 10 : index
    %c0_37 = arith.constant 0 : index
    %116 = vector.load %arg11[%c10, %c0_37] : memref<16x128xf32, #tpu.memory_space<vmem>>, vector<2x128xf32>
    %cst_38 = arith.constant dense<0.000000e+00> : vector<2x128xf32>
    %117 = tpu.matmul %114, %7, %cst_38 {dimension_numbers = #tpu.dot_dimension_numbers<[1], [0], [0], [1], [0, 0, 1, 1], [], []>} : vector<2x32xf32>, vector<32x128xf32>, vector<2x128xf32> -> vector<2x128xf32>
    %118 = arith.addf %116, %117 : vector<2x128xf32>
    %119 = math.tanh %118 : vector<2x128xf32>
    %120 = arith.negf %118 : vector<2x128xf32>
    %121 = math.exp %120 : vector<2x128xf32>
    %cst_39 = arith.constant 1.000000e+00 : f32
    %122 = vector.broadcast %cst_39 : f32 to vector<2x128xf32>
    %123 = arith.addf %122, %121 : vector<2x128xf32>
    %124 = arith.divf %122, %123 : vector<2x128xf32>
    %125 = arith.select %5, %119, %124 : vector<2x128xi1>, vector<2x128xf32>
    %126 = vector.extract_strided_slice %125 {offsets = [0, 0], sizes = [2, 32], strides = [1, 1]} : vector<2x128xf32> to vector<2x32xf32>
    %127 = vector.extract_strided_slice %125 {offsets = [0, 32], sizes = [2, 32], strides = [1, 1]} : vector<2x128xf32> to vector<2x32xf32>
    %128 = vector.extract_strided_slice %125 {offsets = [0, 64], sizes = [2, 32], strides = [1, 1]} : vector<2x128xf32> to vector<2x32xf32>
    %129 = vector.extract_strided_slice %125 {offsets = [0, 96], sizes = [2, 32], strides = [1, 1]} : vector<2x128xf32> to vector<2x32xf32>
    %130 = arith.mulf %127, %112 : vector<2x32xf32>
    %131 = arith.mulf %126, %128 : vector<2x32xf32>
    %132 = arith.addf %130, %131 : vector<2x32xf32>
    %133 = math.tanh %132 : vector<2x32xf32>
    %134 = arith.mulf %129, %133 : vector<2x32xf32>
    %c10_40 = arith.constant 10 : index
    %c0_41 = arith.constant 0 : index
    %135 = vector.load %arg12[%c10_40, %c0_41] : memref<16x32xf32, #tpu.memory_space<vmem>>, vector<2x32xf32>
    tpu.vector_store %arg12[%c10_40, %c0_41], %134 {strides = array<i32>} : memref<16x32xf32, #tpu.memory_space<vmem>>, vector<2x32xf32>,
    %c12 = arith.constant 12 : index
    %c0_42 = arith.constant 0 : index
    %136 = vector.load %arg11[%c12, %c0_42] : memref<16x128xf32, #tpu.memory_space<vmem>>, vector<2x128xf32>
    %cst_43 = arith.constant dense<0.000000e+00> : vector<2x128xf32>
    %137 = tpu.matmul %134, %7, %cst_43 {dimension_numbers = #tpu.dot_dimension_numbers<[1], [0], [0], [1], [0, 0, 1, 1], [], []>} : vector<2x32xf32>, vector<32x128xf32>, vector<2x128xf32> -> vector<2x128xf32>
    %138 = arith.addf %136, %137 : vector<2x128xf32>
    %139 = math.tanh %138 : vector<2x128xf32>
    %140 = arith.negf %138 : vector<2x128xf32>
    %141 = math.exp %140 : vector<2x128xf32>
    %cst_44 = arith.constant 1.000000e+00 : f32
    %142 = vector.broadcast %cst_44 : f32 to vector<2x128xf32>
    %143 = arith.addf %142, %141 : vector<2x128xf32>
    %144 = arith.divf %142, %143 : vector<2x128xf32>
    %145 = arith.select %5, %139, %144 : vector<2x128xi1>, vector<2x128xf32>
    %146 = vector.extract_strided_slice %145 {offsets = [0, 0], sizes = [2, 32], strides = [1, 1]} : vector<2x128xf32> to vector<2x32xf32>
    %147 = vector.extract_strided_slice %145 {offsets = [0, 32], sizes = [2, 32], strides = [1, 1]} : vector<2x128xf32> to vector<2x32xf32>
    %148 = vector.extract_strided_slice %145 {offsets = [0, 64], sizes = [2, 32], strides = [1, 1]} : vector<2x128xf32> to vector<2x32xf32>
    %149 = vector.extract_strided_slice %145 {offsets = [0, 96], sizes = [2, 32], strides = [1, 1]} : vector<2x128xf32> to vector<2x32xf32>
    %150 = arith.mulf %147, %132 : vector<2x32xf32>
    %151 = arith.mulf %146, %148 : vector<2x32xf32>
    %152 = arith.addf %150, %151 : vector<2x32xf32>
    %153 = math.tanh %152 : vector<2x32xf32>
    %154 = arith.mulf %149, %153 : vector<2x32xf32>
    %c12_45 = arith.constant 12 : index
    %c0_46 = arith.constant 0 : index
    %155 = vector.load %arg12[%c12_45, %c0_46] : memref<16x32xf32, #tpu.memory_space<vmem>>, vector<2x32xf32>
    tpu.vector_store %arg12[%c12_45, %c0_46], %154 {strides = array<i32>} : memref<16x32xf32, #tpu.memory_space<vmem>>, vector<2x32xf32>,
    %c14 = arith.constant 14 : index
    %c0_47 = arith.constant 0 : index
    %156 = vector.load %arg11[%c14, %c0_47] : memref<16x128xf32, #tpu.memory_space<vmem>>, vector<2x128xf32>
    %cst_48 = arith.constant dense<0.000000e+00> : vector<2x128xf32>
    %157 = tpu.matmul %154, %7, %cst_48 {dimension_numbers = #tpu.dot_dimension_numbers<[1], [0], [0], [1], [0, 0, 1, 1], [], []>} : vector<2x32xf32>, vector<32x128xf32>, vector<2x128xf32> -> vector<2x128xf32>
    %158 = arith.addf %156, %157 : vector<2x128xf32>
    %159 = math.tanh %158 : vector<2x128xf32>
    %160 = arith.negf %158 : vector<2x128xf32>
    %161 = math.exp %160 : vector<2x128xf32>
    %cst_49 = arith.constant 1.000000e+00 : f32
    %162 = vector.broadcast %cst_49 : f32 to vector<2x128xf32>
    %163 = arith.addf %162, %161 : vector<2x128xf32>
    %164 = arith.divf %162, %163 : vector<2x128xf32>
    %165 = arith.select %5, %159, %164 : vector<2x128xi1>, vector<2x128xf32>
    %166 = vector.extract_strided_slice %165 {offsets = [0, 0], sizes = [2, 32], strides = [1, 1]} : vector<2x128xf32> to vector<2x32xf32>
    %167 = vector.extract_strided_slice %165 {offsets = [0, 32], sizes = [2, 32], strides = [1, 1]} : vector<2x128xf32> to vector<2x32xf32>
    %168 = vector.extract_strided_slice %165 {offsets = [0, 64], sizes = [2, 32], strides = [1, 1]} : vector<2x128xf32> to vector<2x32xf32>
    %169 = vector.extract_strided_slice %165 {offsets = [0, 96], sizes = [2, 32], strides = [1, 1]} : vector<2x128xf32> to vector<2x32xf32>
    %170 = arith.mulf %167, %152 : vector<2x32xf32>
    %171 = arith.mulf %166, %168 : vector<2x32xf32>
    %172 = arith.addf %170, %171 : vector<2x32xf32>
    %173 = math.tanh %172 : vector<2x32xf32>
    %174 = arith.mulf %169, %173 : vector<2x32xf32>
    %c14_50 = arith.constant 14 : index
    %c0_51 = arith.constant 0 : index
    %175 = vector.load %arg12[%c14_50, %c0_51] : memref<16x32xf32, #tpu.memory_space<vmem>>, vector<2x32xf32>
    tpu.vector_store %arg12[%c14_50, %c0_51], %174 {strides = array<i32>} : memref<16x32xf32, #tpu.memory_space<vmem>>, vector<2x32xf32>,
    %c0_52 = arith.constant 0 : index
    %c0_53 = arith.constant 0 : index
    %176 = vector.load %arg5[%c0_52, %c0_53] : memref<32x128xf32, #tpu.memory_space<vmem>>, vector<32x128xf32>
    %c0_54 = arith.constant 0 : index
    %c0_55 = arith.constant 0 : index
    %177 = vector.load %arg6[%c0_54, %c0_55] : memref<32x128xf32, #tpu.memory_space<vmem>>, vector<32x128xf32>
    %c0_56 = arith.constant 0 : index
    %c0_57 = arith.constant 0 : index
    %178 = vector.load %arg7[%c0_56, %c0_57] : memref<1x128xf32, #tpu.memory_space<vmem>>, vector<1x128xf32>
    %c0_58 = arith.constant 0 : index
    %c0_59 = arith.constant 0 : index
    %179 = vector.load %arg12[%c0_58, %c0_59] : memref<16x32xf32, #tpu.memory_space<vmem>>, vector<16x32xf32>
    %cst_60 = arith.constant dense<0.000000e+00> : vector<16x128xf32>
    %180 = tpu.matmul %179, %176, %cst_60 {dimension_numbers = #tpu.dot_dimension_numbers<[1], [0], [0], [1], [0, 0, 1, 1], [], []>} : vector<16x32xf32>, vector<32x128xf32>, vector<16x128xf32> -> vector<16x128xf32>
    %181 = vector.broadcast %178 : vector<1x128xf32> to vector<16x128xf32>
    %182 = arith.addf %180, %181 : vector<16x128xf32>
    %c0_61 = arith.constant 0 : index
    %c0_62 = arith.constant 0 : index
    %183 = vector.load %arg11[%c0_61, %c0_62] : memref<16x128xf32, #tpu.memory_space<vmem>>, vector<16x128xf32>
    tpu.vector_store %arg11[%c0_61, %c0_62], %182 {strides = array<i32>} : memref<16x128xf32, #tpu.memory_space<vmem>>, vector<16x128xf32>,
    %cst_63 = arith.constant 0.000000e+00 : f32
    %184 = vector.broadcast %cst_63 : f32 to vector<2x32xf32>
    %cst_64 = arith.constant 0.000000e+00 : f32
    %185 = vector.broadcast %cst_64 : f32 to vector<2x32xf32>
    %c0_65 = arith.constant 0 : index
    %c0_66 = arith.constant 0 : index
    %186 = vector.load %arg11[%c0_65, %c0_66] : memref<16x128xf32, #tpu.memory_space<vmem>>, vector<2x128xf32>
    %cst_67 = arith.constant dense<0.000000e+00> : vector<2x128xf32>
    %187 = tpu.matmul %184, %177, %cst_67 {dimension_numbers = #tpu.dot_dimension_numbers<[1], [0], [0], [1], [0, 0, 1, 1], [], []>} : vector<2x32xf32>, vector<32x128xf32>, vector<2x128xf32> -> vector<2x128xf32>
    %188 = arith.addf %186, %187 : vector<2x128xf32>
    %189 = math.tanh %188 : vector<2x128xf32>
    %190 = arith.negf %188 : vector<2x128xf32>
    %191 = math.exp %190 : vector<2x128xf32>
    %cst_68 = arith.constant 1.000000e+00 : f32
    %192 = vector.broadcast %cst_68 : f32 to vector<2x128xf32>
    %193 = arith.addf %192, %191 : vector<2x128xf32>
    %194 = arith.divf %192, %193 : vector<2x128xf32>
    %195 = arith.select %5, %189, %194 : vector<2x128xi1>, vector<2x128xf32>
    %196 = vector.extract_strided_slice %195 {offsets = [0, 0], sizes = [2, 32], strides = [1, 1]} : vector<2x128xf32> to vector<2x32xf32>
    %197 = vector.extract_strided_slice %195 {offsets = [0, 32], sizes = [2, 32], strides = [1, 1]} : vector<2x128xf32> to vector<2x32xf32>
    %198 = vector.extract_strided_slice %195 {offsets = [0, 64], sizes = [2, 32], strides = [1, 1]} : vector<2x128xf32> to vector<2x32xf32>
    %199 = vector.extract_strided_slice %195 {offsets = [0, 96], sizes = [2, 32], strides = [1, 1]} : vector<2x128xf32> to vector<2x32xf32>
    %200 = arith.mulf %197, %185 : vector<2x32xf32>
    %201 = arith.mulf %196, %198 : vector<2x32xf32>
    %202 = arith.addf %200, %201 : vector<2x32xf32>
    %203 = math.tanh %202 : vector<2x32xf32>
    %204 = arith.mulf %199, %203 : vector<2x32xf32>
    %c2_69 = arith.constant 2 : index
    %c0_70 = arith.constant 0 : index
    %205 = vector.load %arg11[%c2_69, %c0_70] : memref<16x128xf32, #tpu.memory_space<vmem>>, vector<2x128xf32>
    %cst_71 = arith.constant dense<0.000000e+00> : vector<2x128xf32>
    %206 = tpu.matmul %204, %177, %cst_71 {dimension_numbers = #tpu.dot_dimension_numbers<[1], [0], [0], [1], [0, 0, 1, 1], [], []>} : vector<2x32xf32>, vector<32x128xf32>, vector<2x128xf32> -> vector<2x128xf32>
    %207 = arith.addf %205, %206 : vector<2x128xf32>
    %208 = math.tanh %207 : vector<2x128xf32>
    %209 = arith.negf %207 : vector<2x128xf32>
    %210 = math.exp %209 : vector<2x128xf32>
    %cst_72 = arith.constant 1.000000e+00 : f32
    %211 = vector.broadcast %cst_72 : f32 to vector<2x128xf32>
    %212 = arith.addf %211, %210 : vector<2x128xf32>
    %213 = arith.divf %211, %212 : vector<2x128xf32>
    %214 = arith.select %5, %208, %213 : vector<2x128xi1>, vector<2x128xf32>
    %215 = vector.extract_strided_slice %214 {offsets = [0, 0], sizes = [2, 32], strides = [1, 1]} : vector<2x128xf32> to vector<2x32xf32>
    %216 = vector.extract_strided_slice %214 {offsets = [0, 32], sizes = [2, 32], strides = [1, 1]} : vector<2x128xf32> to vector<2x32xf32>
    %217 = vector.extract_strided_slice %214 {offsets = [0, 64], sizes = [2, 32], strides = [1, 1]} : vector<2x128xf32> to vector<2x32xf32>
    %218 = vector.extract_strided_slice %214 {offsets = [0, 96], sizes = [2, 32], strides = [1, 1]} : vector<2x128xf32> to vector<2x32xf32>
    %219 = arith.mulf %216, %202 : vector<2x32xf32>
    %220 = arith.mulf %215, %217 : vector<2x32xf32>
    %221 = arith.addf %219, %220 : vector<2x32xf32>
    %222 = math.tanh %221 : vector<2x32xf32>
    %223 = arith.mulf %218, %222 : vector<2x32xf32>
    %c4_73 = arith.constant 4 : index
    %c0_74 = arith.constant 0 : index
    %224 = vector.load %arg11[%c4_73, %c0_74] : memref<16x128xf32, #tpu.memory_space<vmem>>, vector<2x128xf32>
    %cst_75 = arith.constant dense<0.000000e+00> : vector<2x128xf32>
    %225 = tpu.matmul %223, %177, %cst_75 {dimension_numbers = #tpu.dot_dimension_numbers<[1], [0], [0], [1], [0, 0, 1, 1], [], []>} : vector<2x32xf32>, vector<32x128xf32>, vector<2x128xf32> -> vector<2x128xf32>
    %226 = arith.addf %224, %225 : vector<2x128xf32>
    %227 = math.tanh %226 : vector<2x128xf32>
    %228 = arith.negf %226 : vector<2x128xf32>
    %229 = math.exp %228 : vector<2x128xf32>
    %cst_76 = arith.constant 1.000000e+00 : f32
    %230 = vector.broadcast %cst_76 : f32 to vector<2x128xf32>
    %231 = arith.addf %230, %229 : vector<2x128xf32>
    %232 = arith.divf %230, %231 : vector<2x128xf32>
    %233 = arith.select %5, %227, %232 : vector<2x128xi1>, vector<2x128xf32>
    %234 = vector.extract_strided_slice %233 {offsets = [0, 0], sizes = [2, 32], strides = [1, 1]} : vector<2x128xf32> to vector<2x32xf32>
    %235 = vector.extract_strided_slice %233 {offsets = [0, 32], sizes = [2, 32], strides = [1, 1]} : vector<2x128xf32> to vector<2x32xf32>
    %236 = vector.extract_strided_slice %233 {offsets = [0, 64], sizes = [2, 32], strides = [1, 1]} : vector<2x128xf32> to vector<2x32xf32>
    %237 = vector.extract_strided_slice %233 {offsets = [0, 96], sizes = [2, 32], strides = [1, 1]} : vector<2x128xf32> to vector<2x32xf32>
    %238 = arith.mulf %235, %221 : vector<2x32xf32>
    %239 = arith.mulf %234, %236 : vector<2x32xf32>
    %240 = arith.addf %238, %239 : vector<2x32xf32>
    %241 = math.tanh %240 : vector<2x32xf32>
    %242 = arith.mulf %237, %241 : vector<2x32xf32>
    %c6_77 = arith.constant 6 : index
    %c0_78 = arith.constant 0 : index
    %243 = vector.load %arg11[%c6_77, %c0_78] : memref<16x128xf32, #tpu.memory_space<vmem>>, vector<2x128xf32>
    %cst_79 = arith.constant dense<0.000000e+00> : vector<2x128xf32>
    %244 = tpu.matmul %242, %177, %cst_79 {dimension_numbers = #tpu.dot_dimension_numbers<[1], [0], [0], [1], [0, 0, 1, 1], [], []>} : vector<2x32xf32>, vector<32x128xf32>, vector<2x128xf32> -> vector<2x128xf32>
    %245 = arith.addf %243, %244 : vector<2x128xf32>
    %246 = math.tanh %245 : vector<2x128xf32>
    %247 = arith.negf %245 : vector<2x128xf32>
    %248 = math.exp %247 : vector<2x128xf32>
    %cst_80 = arith.constant 1.000000e+00 : f32
    %249 = vector.broadcast %cst_80 : f32 to vector<2x128xf32>
    %250 = arith.addf %249, %248 : vector<2x128xf32>
    %251 = arith.divf %249, %250 : vector<2x128xf32>
    %252 = arith.select %5, %246, %251 : vector<2x128xi1>, vector<2x128xf32>
    %253 = vector.extract_strided_slice %252 {offsets = [0, 0], sizes = [2, 32], strides = [1, 1]} : vector<2x128xf32> to vector<2x32xf32>
    %254 = vector.extract_strided_slice %252 {offsets = [0, 32], sizes = [2, 32], strides = [1, 1]} : vector<2x128xf32> to vector<2x32xf32>
    %255 = vector.extract_strided_slice %252 {offsets = [0, 64], sizes = [2, 32], strides = [1, 1]} : vector<2x128xf32> to vector<2x32xf32>
    %256 = vector.extract_strided_slice %252 {offsets = [0, 96], sizes = [2, 32], strides = [1, 1]} : vector<2x128xf32> to vector<2x32xf32>
    %257 = arith.mulf %254, %240 : vector<2x32xf32>
    %258 = arith.mulf %253, %255 : vector<2x32xf32>
    %259 = arith.addf %257, %258 : vector<2x32xf32>
    %260 = math.tanh %259 : vector<2x32xf32>
    %261 = arith.mulf %256, %260 : vector<2x32xf32>
    %c8_81 = arith.constant 8 : index
    %c0_82 = arith.constant 0 : index
    %262 = vector.load %arg11[%c8_81, %c0_82] : memref<16x128xf32, #tpu.memory_space<vmem>>, vector<2x128xf32>
    %cst_83 = arith.constant dense<0.000000e+00> : vector<2x128xf32>
    %263 = tpu.matmul %261, %177, %cst_83 {dimension_numbers = #tpu.dot_dimension_numbers<[1], [0], [0], [1], [0, 0, 1, 1], [], []>} : vector<2x32xf32>, vector<32x128xf32>, vector<2x128xf32> -> vector<2x128xf32>
    %264 = arith.addf %262, %263 : vector<2x128xf32>
    %265 = math.tanh %264 : vector<2x128xf32>
    %266 = arith.negf %264 : vector<2x128xf32>
    %267 = math.exp %266 : vector<2x128xf32>
    %cst_84 = arith.constant 1.000000e+00 : f32
    %268 = vector.broadcast %cst_84 : f32 to vector<2x128xf32>
    %269 = arith.addf %268, %267 : vector<2x128xf32>
    %270 = arith.divf %268, %269 : vector<2x128xf32>
    %271 = arith.select %5, %265, %270 : vector<2x128xi1>, vector<2x128xf32>
    %272 = vector.extract_strided_slice %271 {offsets = [0, 0], sizes = [2, 32], strides = [1, 1]} : vector<2x128xf32> to vector<2x32xf32>
    %273 = vector.extract_strided_slice %271 {offsets = [0, 32], sizes = [2, 32], strides = [1, 1]} : vector<2x128xf32> to vector<2x32xf32>
    %274 = vector.extract_strided_slice %271 {offsets = [0, 64], sizes = [2, 32], strides = [1, 1]} : vector<2x128xf32> to vector<2x32xf32>
    %275 = vector.extract_strided_slice %271 {offsets = [0, 96], sizes = [2, 32], strides = [1, 1]} : vector<2x128xf32> to vector<2x32xf32>
    %276 = arith.mulf %273, %259 : vector<2x32xf32>
    %277 = arith.mulf %272, %274 : vector<2x32xf32>
    %278 = arith.addf %276, %277 : vector<2x32xf32>
    %279 = math.tanh %278 : vector<2x32xf32>
    %280 = arith.mulf %275, %279 : vector<2x32xf32>
    %c10_85 = arith.constant 10 : index
    %c0_86 = arith.constant 0 : index
    %281 = vector.load %arg11[%c10_85, %c0_86] : memref<16x128xf32, #tpu.memory_space<vmem>>, vector<2x128xf32>
    %cst_87 = arith.constant dense<0.000000e+00> : vector<2x128xf32>
    %282 = tpu.matmul %280, %177, %cst_87 {dimension_numbers = #tpu.dot_dimension_numbers<[1], [0], [0], [1], [0, 0, 1, 1], [], []>} : vector<2x32xf32>, vector<32x128xf32>, vector<2x128xf32> -> vector<2x128xf32>
    %283 = arith.addf %281, %282 : vector<2x128xf32>
    %284 = math.tanh %283 : vector<2x128xf32>
    %285 = arith.negf %283 : vector<2x128xf32>
    %286 = math.exp %285 : vector<2x128xf32>
    %cst_88 = arith.constant 1.000000e+00 : f32
    %287 = vector.broadcast %cst_88 : f32 to vector<2x128xf32>
    %288 = arith.addf %287, %286 : vector<2x128xf32>
    %289 = arith.divf %287, %288 : vector<2x128xf32>
    %290 = arith.select %5, %284, %289 : vector<2x128xi1>, vector<2x128xf32>
    %291 = vector.extract_strided_slice %290 {offsets = [0, 0], sizes = [2, 32], strides = [1, 1]} : vector<2x128xf32> to vector<2x32xf32>
    %292 = vector.extract_strided_slice %290 {offsets = [0, 32], sizes = [2, 32], strides = [1, 1]} : vector<2x128xf32> to vector<2x32xf32>
    %293 = vector.extract_strided_slice %290 {offsets = [0, 64], sizes = [2, 32], strides = [1, 1]} : vector<2x128xf32> to vector<2x32xf32>
    %294 = vector.extract_strided_slice %290 {offsets = [0, 96], sizes = [2, 32], strides = [1, 1]} : vector<2x128xf32> to vector<2x32xf32>
    %295 = arith.mulf %292, %278 : vector<2x32xf32>
    %296 = arith.mulf %291, %293 : vector<2x32xf32>
    %297 = arith.addf %295, %296 : vector<2x32xf32>
    %298 = math.tanh %297 : vector<2x32xf32>
    %299 = arith.mulf %294, %298 : vector<2x32xf32>
    %c12_89 = arith.constant 12 : index
    %c0_90 = arith.constant 0 : index
    %300 = vector.load %arg11[%c12_89, %c0_90] : memref<16x128xf32, #tpu.memory_space<vmem>>, vector<2x128xf32>
    %cst_91 = arith.constant dense<0.000000e+00> : vector<2x128xf32>
    %301 = tpu.matmul %299, %177, %cst_91 {dimension_numbers = #tpu.dot_dimension_numbers<[1], [0], [0], [1], [0, 0, 1, 1], [], []>} : vector<2x32xf32>, vector<32x128xf32>, vector<2x128xf32> -> vector<2x128xf32>
    %302 = arith.addf %300, %301 : vector<2x128xf32>
    %303 = math.tanh %302 : vector<2x128xf32>
    %304 = arith.negf %302 : vector<2x128xf32>
    %305 = math.exp %304 : vector<2x128xf32>
    %cst_92 = arith.constant 1.000000e+00 : f32
    %306 = vector.broadcast %cst_92 : f32 to vector<2x128xf32>
    %307 = arith.addf %306, %305 : vector<2x128xf32>
    %308 = arith.divf %306, %307 : vector<2x128xf32>
    %309 = arith.select %5, %303, %308 : vector<2x128xi1>, vector<2x128xf32>
    %310 = vector.extract_strided_slice %309 {offsets = [0, 0], sizes = [2, 32], strides = [1, 1]} : vector<2x128xf32> to vector<2x32xf32>
    %311 = vector.extract_strided_slice %309 {offsets = [0, 32], sizes = [2, 32], strides = [1, 1]} : vector<2x128xf32> to vector<2x32xf32>
    %312 = vector.extract_strided_slice %309 {offsets = [0, 64], sizes = [2, 32], strides = [1, 1]} : vector<2x128xf32> to vector<2x32xf32>
    %313 = vector.extract_strided_slice %309 {offsets = [0, 96], sizes = [2, 32], strides = [1, 1]} : vector<2x128xf32> to vector<2x32xf32>
    %314 = arith.mulf %311, %297 : vector<2x32xf32>
    %315 = arith.mulf %310, %312 : vector<2x32xf32>
    %316 = arith.addf %314, %315 : vector<2x32xf32>
    %317 = math.tanh %316 : vector<2x32xf32>
    %318 = arith.mulf %313, %317 : vector<2x32xf32>
    %c14_93 = arith.constant 14 : index
    %c0_94 = arith.constant 0 : index
    %319 = vector.load %arg11[%c14_93, %c0_94] : memref<16x128xf32, #tpu.memory_space<vmem>>, vector<2x128xf32>
    %cst_95 = arith.constant dense<0.000000e+00> : vector<2x128xf32>
    %320 = tpu.matmul %318, %177, %cst_95 {dimension_numbers = #tpu.dot_dimension_numbers<[1], [0], [0], [1], [0, 0, 1, 1], [], []>} : vector<2x32xf32>, vector<32x128xf32>, vector<2x128xf32> -> vector<2x128xf32>
    %321 = arith.addf %319, %320 : vector<2x128xf32>
    %322 = math.tanh %321 : vector<2x128xf32>
    %323 = arith.negf %321 : vector<2x128xf32>
    %324 = math.exp %323 : vector<2x128xf32>
    %cst_96 = arith.constant 1.000000e+00 : f32
    %325 = vector.broadcast %cst_96 : f32 to vector<2x128xf32>
    %326 = arith.addf %325, %324 : vector<2x128xf32>
    %327 = arith.divf %325, %326 : vector<2x128xf32>
    %328 = arith.select %5, %322, %327 : vector<2x128xi1>, vector<2x128xf32>
    %329 = vector.extract_strided_slice %328 {offsets = [0, 0], sizes = [2, 32], strides = [1, 1]} : vector<2x128xf32> to vector<2x32xf32>
    %330 = vector.extract_strided_slice %328 {offsets = [0, 32], sizes = [2, 32], strides = [1, 1]} : vector<2x128xf32> to vector<2x32xf32>
    %331 = vector.extract_strided_slice %328 {offsets = [0, 64], sizes = [2, 32], strides = [1, 1]} : vector<2x128xf32> to vector<2x32xf32>
    %332 = vector.extract_strided_slice %328 {offsets = [0, 96], sizes = [2, 32], strides = [1, 1]} : vector<2x128xf32> to vector<2x32xf32>
    %333 = arith.mulf %330, %316 : vector<2x32xf32>
    %334 = arith.mulf %329, %331 : vector<2x32xf32>
    %335 = arith.addf %333, %334 : vector<2x32xf32>
    %336 = math.tanh %335 : vector<2x32xf32>
    %337 = arith.mulf %332, %336 : vector<2x32xf32>
    %c0_97 = arith.constant 0 : index
    %c0_98 = arith.constant 0 : index
    %338 = vector.load %arg8[%c0_97, %c0_98] : memref<32x8xf32, #tpu.memory_space<vmem>>, vector<32x8xf32>
    %cst_99 = arith.constant dense<0.000000e+00> : vector<2x8xf32>
    %339 = tpu.matmul %337, %338, %cst_99 {dimension_numbers = #tpu.dot_dimension_numbers<[1], [0], [0], [1], [0, 0, 1, 1], [], []>} : vector<2x32xf32>, vector<32x8xf32>, vector<2x8xf32> -> vector<2x8xf32>
    %c0_100 = arith.constant 0 : index
    %c0_101 = arith.constant 0 : index
    %340 = vector.load %arg9[%c0_100, %c0_101] : memref<1x8xf32, #tpu.memory_space<vmem>>, vector<1x8xf32>
    %341 = vector.broadcast %340 : vector<1x8xf32> to vector<2x8xf32>
    %342 = arith.addf %339, %341 : vector<2x8xf32>
    %c0_102 = arith.constant 0 : index
    %c0_103 = arith.constant 0 : index
    %343 = vector.load %arg10[%c0_102, %c0_103] : memref<2x8xf32, #tpu.memory_space<vmem>>, vector<2x8xf32>
    tpu.vector_store %arg10[%c0_102, %c0_103], %342 {strides = array<i32>} : memref<2x8xf32, #tpu.memory_space<vmem>>, vector<2x8xf32>,
    return
  }
  func.func @transform_0(%arg0: i32) -> (i32, i32) {
    %c0_i32 = arith.constant 0 : i32
    %c0_i32_0 = arith.constant 0 : i32
    %c0_i32_1 = arith.constant 0 : i32
    return %c0_i32, %c0_i32_0 : i32, i32
  }
  func.func @transform_1(%arg0: i32) -> (i32, i32) {
    %c0_i32 = arith.constant 0 : i32
    %c0_i32_0 = arith.constant 0 : i32
    %c0_i32_1 = arith.constant 0 : i32
    return %c0_i32, %c0_i32_0 : i32, i32
  }
  func.func @transform_2(%arg0: i32) -> (i32, i32) {
    %c0_i32 = arith.constant 0 : i32
    %c0_i32_0 = arith.constant 0 : i32
    %c0_i32_1 = arith.constant 0 : i32
    return %c0_i32, %c0_i32_0 : i32, i32
  }
  func.func @transform_3(%arg0: i32) -> (i32, i32) {
    %c0_i32 = arith.constant 0 : i32
    %c0_i32_0 = arith.constant 0 : i32
    %c0_i32_1 = arith.constant 0 : i32
    return %c0_i32, %c0_i32_0 : i32, i32
  }
  func.func @transform_4(%arg0: i32) -> (i32, i32) {
    %c0_i32 = arith.constant 0 : i32
    %c0_i32_0 = arith.constant 0 : i32
    %c0_i32_1 = arith.constant 0 : i32
    return %c0_i32, %c0_i32_0 : i32, i32
  }
  func.func @transform_5(%arg0: i32) -> (i32, i32) {
    %c0_i32 = arith.constant 0 : i32
    %c0_i32_0 = arith.constant 0 : i32
    %c0_i32_1 = arith.constant 0 : i32
    return %c0_i32, %c0_i32_0 : i32, i32
  }
  func.func @transform_6(%arg0: i32) -> (i32, i32) {
    %c0_i32 = arith.constant 0 : i32
    %c0_i32_0 = arith.constant 0 : i32
    %c0_i32_1 = arith.constant 0 : i32
    return %c0_i32, %c0_i32_0 : i32, i32
  }
  func.func @transform_7(%arg0: i32) -> (i32, i32) {
    %c0_i32 = arith.constant 0 : i32
    %c0_i32_0 = arith.constant 0 : i32
    %c0_i32_1 = arith.constant 0 : i32
    return %c0_i32, %c0_i32_0 : i32, i32
  }
  func.func @transform_8(%arg0: i32) -> (i32, i32) {
    %c0_i32 = arith.constant 0 : i32
    %c0_i32_0 = arith.constant 0 : i32
    %c0_i32_1 = arith.constant 0 : i32
    return %c0_i32, %c0_i32_0 : i32, i32
  }
  func.func @transform_9(%arg0: i32) -> (i32, i32) {
    %c0_i32 = arith.constant 0 : i32
    %c0_i32_0 = arith.constant 0 : i32
    %c0_i32_1 = arith.constant 0 : i32
    return %c0_i32, %c0_i32_0 : i32, i32
  }
}

</mosaic_0001>

<bundles_post_ra>
// kernel: my_lstm_forward_impl.1
= control target key start
LH: loop header
LB: loop body
LE: loop exit
PB: predicated region body
PF: predicated region fallthrough
CT: control target
= control target key end

     0   :  { %14 = vsyncpa [#allocation5], 0  ;;  %s3068_s0 = inlined_call_operand.vmem [shape: f32[16,16], index: 0, kind: input, shape index: {}]   ;;  %s3069_s1 = inlined_call_operand.hbm [shape: f32[16,128], index: 1, kind: input, shape index: {}]   ;;  %s3070_s2 = inlined_call_operand.vmem [shape: f32[32,128], index: 2, kind: input, shape index: {}]   ;;  %s3071_s3 = inlined_call_operand.vmem [shape: f32[1,128], index: 3, kind: input, shape index: {}]   ;;  %s3072_s4 = inlined_call_operand.vmem [shape: f32[32,128], index: 4, kind: input, shape index: {}]   ;;  %s3073_s5 = inlined_call_operand.vmem [shape: f32[32,128], index: 5, kind: input, shape index: {}]   ;;  %s3074_s6 = inlined_call_operand.vmem [shape: f32[1,128], index: 6, kind: input, shape index: {}]   ;;  %s3075_s7 = inlined_call_operand.vmem [shape: f32[32,8], index: 7, kind: input, shape index: {}]   ;;  %s3076_s8 = inlined_call_operand.hbm [shape: f32[1,8], index: 8, kind: input, shape index: {}]   ;;  %s3077_s9 = inlined_call_operand.hbm [shape: f32[2,8], index: 9, kind: output, shape index: {}]  }
   0x1   :  { %15 = vsyncpa [#allocation8], 0 }
   0x2   :  { %16 = vsyncpa [#allocation6], 0  ;;  %s2675_s30 = smov [#allocation4]   ;;  %s2603_s13 = scalar_lea.hbm %s3069_s1, 256 }
   0x3   :  { %s24_s10 = sshll.u32 %s2675_s30, 4  ;;  %p2604_p0 = scmp.ne.s32.totalorder %s3069_s1, %s2603_s13  ;;  %s25_s10 = int_to_ptr.vmem [resolvable:$true] %s24_s10 }
   0x4   :  { %p2607_p1 = scmp.lt.u32.totalorder %s2603_s13, %s3069_s1 }
   0x6   :  { %p2609_p2 = pnand %p2607_p1, %p2604_p0 }
   0x8   :  { %2612 = shalt.err (!%p2609_p2)
}
   0x9   :  { %s2613_s18 = scalar_lea.vmem %s25_s10, 256  ;;  %p2618_p4 = scmp.lt.s32.totalorder %s25_s10, %s25_s10 }
   0xa   :  { %p2614_p3 = scmp.ne.s32.totalorder %s25_s10, %s2613_s18  ;;  %p2619_p5 = scmp.lt.s32.totalorder %s2613_s18, %s2613_s18 }
   0xc   :  { %p2620_p6 = por %p2619_p5, %p2618_p4 }
   0xe   :  { %p2621_p7 = pnand %p2620_p6, %p2614_p3 }
  0x10   :  { %2624 = shalt.err (!%p2621_p7)
}
  0x11   :  { %s2676_s19 = smov 128   ;;  %s2677_s20 = smov 8  }
  0x12   :  { %30 = dma.hbm_to_vmem [thread:$0]  %s3069_s1, 256, %s25_s10, [#allocation5], %s2676_s19, %s2676_s19, %s2677_s20  }
  0x13   :  { %s2678_s23 = smov [#allocation7]   ;;  %s2625_s27 = scalar_lea.hbm %s3076_s8, 16 }
  0x14   :  { %s49_s24 = sshll.u32 %s2678_s23, 4  ;;  %p2626_p8 = scmp.ne.s32.totalorder %s3076_s8, %s2625_s27  ;;  %s50_s24 = int_to_ptr.vmem [resolvable:$true] %s49_s24 }
  0x15   :  { %p2629_p9 = scmp.lt.u32.totalorder %s2625_s27, %s3076_s8 }
  0x17   :  { %p2631_p10 = pnand %p2629_p9, %p2626_p8 }
  0x19   :  { %2634 = shalt.err (!%p2631_p10)
}
  0x1a   :  { %s2635_s12 = scalar_lea.vmem %s50_s24, 16  ;;  %s2639_s1 = scalar_lea.vmem %s50_s24, 32 }
  0x1b   :  { %p2636_p11 = scmp.ne.s32.totalorder %s50_s24, %s2635_s12  ;;  %p2640_p12 = scmp.lt.s32.totalorder %s50_s24, %s50_s24 }
  0x1c   :  { %p2641_p13 = scmp.lt.s32.totalorder %s2639_s1, %s2635_s12 }
  0x1e   :  { %p2642_p0 = por %p2641_p13, %p2640_p12 }
  0x20   :  { %p2643_p1 = pnand %p2642_p0, %p2636_p11 }
  0x22   :  { %2646 = shalt.err (!%p2643_p1)
}
  0x23   :  { %52 = dma.hbm_to_vmem [thread:$0]  %s3076_s8, 16, %s50_s24, [#allocation8]  }
  0x24   :  { %2669 = dma.done.wait [#allocation5], 256  }
  0x25   :  { %2670 = vsyncadd [#allocation5], 4294967040 }
  0x26   :  { %2671 = dma.done.wait [#allocation8], 16  }
  0x27   :  { %2672 = vsyncadd [#allocation8], 4294967280  ;;  %v2679_v0 = vmov 0.0|0.0   ;;  %vm2680_vm0 = vmmov 0   ;;  %v2681_v1 = vmov 0.0   ;;  %vm79_vm1 = vcmask 130048  }
  0x28   :  { %2355 = vmatprep.subr.bf16.mxu1 %v2679_v0  ;;  %2161 = vmatprep.mubr.msk.f32.mxu1 %vm2680_vm0, %v2681_v1  ;;  %v64_v2 = vld [vmem:[#allocation4] sm:$0xff]  ;;  %v65_v3 = vld [vmem:[#allocation4 + $0x8] sm:$0xff]  ;;  %v68_v9 = vld [vmem:[%s3070_s2 + $0x10] sm:$0xff]  ;;  %v59_v24 = vlaneseq  ;;  %s2683_s25 = smov 32   ;;  %vm268_vm5 = vcmask 254976   ;;  %vm164_vm6 = vcmask 261120  }
  0x29   :  { %v71_v4 = vld [vmem:[%s3068_s0] sm:$0xff]  ;;  %v2351_v5 = vpack.c.bf16 %v65_v3, %v64_v2  ;;  %v67_v7 = vld [vmem:[%s3070_s2 + $0x8] sm:$0xff]  ;;  %v69_v10 = vld [vmem:[%s3070_s2 + $0x18] sm:$0xff]  ;;  %vm1995_vm7 = vcmask 58368  }
  0x2a   :  { %2150 = vmatprep.mubr.msk.f32.mxu0 %vm79_vm1, %v71_v4  ;;  %v66_v6 = vld [vmem:[%s3070_s2] sm:$0xff]  ;;  %v72_v11 = vld [vmem:[%s3068_s0 + $0x8] sm:$0xff]  ;;  %v2784_v12 = vpack.c.bf16 %v69_v10, %v68_v9  ;;  %v60_v26 = vand.u32 127, %v59_v24  ;;  %v1911_v27 = vld [vmem:[%s3075_s7 + $0x10] sm:$0xff]  ;;  %s2684_s2 = smov [#allocation9]  }
  0x2b   :  { %v2772_v8 = vpack.c.bf16 %v67_v7, %v66_v6  ;;  %2352 = vmatprep.subr.bf16.mxu0 %v2351_v5  ;;  %v2013_v13 = vld [vmem:[%s3071_s3] ss:$0 sm:$0xff]  ;;  %s2682_s3 = smov 64   ;;  %s2003_s26 = sshll.u32 %s2684_s2, 4  ;;  %s2004_s26 = int_to_ptr.vmem [resolvable:$true] %s2003_s26 }
  0x2c   :  { %2354 = vmatpush3.bf16.msra.mxu0 %v2351_v5  ;;  %vm61_vm2 = vcmp.ge.s32.totalorder %v60_v26, 64  ;;  %vm62_vm3 = vcmp.lt.s32.totalorder %v60_v26, 96  ;;  %p2652_p3 = scmp.lt.s32.totalorder %s2004_s26, %s2004_s26 }
  0x2d   :  { %2357 = vmatpush3.bf16.msra.mxu1 %v2772_v8  ;;  %2361 = vmatprep.subr.bf16.mxu0 %v2679_v0  ;;  %vm2807_vm4 = vmand %vm61_vm2, %vm62_vm3 }
  0x2e   :  { %2358 = vmatprep.subr.bf16.mxu1 %v2679_v0 }
  0x2f   :  { %2151 = vmatmul.mubr.msk.f32.vlgmr.msra.gmra.mrb[0].mxu0 %vm79_vm1, %v72_v11 }
  0x30   :  { %2363 = vmatpush3.bf16.msra.mxu0 %v2772_v8  ;;  %2172 = vmatprep.mubr.msk.f32.mxu0 %vm2680_vm0, %v2681_v1 }
  0x31   :  { %2360 = vmatpush3.bf16.msra.mxu1 %v2784_v12  ;;  %2364 = vmatprep.subr.bf16.mxu0 %v2679_v0 }
  0x32   :  { %2367 = vmatprep.subr.bf16.mxu1 %v2679_v0 }
  0x34   :  { %2162 = vmatmul.mubr.f32.vlgmr.msra.gmra.mrb[0].mxu1 %v2681_v1  ;;  %2366 = vmatpush3.bf16.msra.mxu0 %v2784_v12 }
  0x35   :  { %2369 = vmatpush3.bf16.msra.mxu1 %v2772_v8  ;;  %2183 = vmatprep.mubr.msk.f32.mxu1 %vm2680_vm0, %v2681_v1 }
  0x36   :  { %2370 = vmatprep.subr.bf16.mxu1 %v2679_v0  ;;  %2373 = vmatprep.subr.bf16.mxu0 %v2679_v0 }
  0x39   :  { %2372 = vmatpush3.bf16.msra.mxu1 %v2784_v12 }
  0x3a   :  { %2379 = vmatprep.subr.bf16.mxu1 %v2679_v0 }
 0x102   :  { %v2152_v14 = vpop.f32.mrb[0].mxu0 }
 0x103   :  { %v158_v15 = vadd.f32 %v2152_v14, %v2013_v13  ;;  %v152_v16 = vpop.f32.mrb[1].mxu0 }
 0x104   :  { %v153_v17 = vadd.f32 %v2013_v13, %v152_v16 }
 0x105   :  { %162 = vst [vmem:[#allocation2 + $0x8] sm:$0xff] %v158_v15 }
 0x106   :  { %161 = vst [vmem:[#allocation2] sm:$0xff] %v153_v17 }
 0x107   :  { %v234_v18 = vpop.f32.mrb[0].mxu1 }
 0x108   :  { %v2163_v19 = vpop.f32.mrb[1].mxu1 }
 0x10d   :  { %v163_v20 = vld [vmem:[#allocation2] sm:$0x3]  ;;  %v270_v40 = vld [vmem:[#allocation2 + $0x2] sm:$0x3]  ;;  %v374_v59 = vld [vmem:[#allocation2 + $0x4] sm:$0x3] }
 0x10e   :  { %v238_v21 = vadd.f32 %v234_v18, %v163_v20  ;;  %v478_v18 = vld [vmem:[#allocation2 + $0x6] sm:$0x3] }
 0x110   :  { %v2016_v22 = vmul.f32 -1.442695, %v238_v21 }
 0x112   :  { %2475 = vpow2.f32 %v2016_v22 }
 0x113   :  { %2477 = vtanh.f32 %v238_v21 }
 0x11c   :  { %v2476_v23 = vpop.eup %2475 }
 0x11d   :  { %v243_v25 = vadd.f32 1.0, %v2476_v23  ;;  %v2478_v28 = vpop.eup %2477 }
 0x11f   :  { %2479 = vrcp.f32 %v243_v25 }
 0x129   :  { %v2480_v29 = vpop.eup %2479 }
 0x12a   :  { %v246_v30 = vsel %vm2807_vm4, %v2478_v28, %v2480_v29 }
 0x12b   :  { %249 = vrot.lane.b32.xlu0 %v246_v30, %s2682_s3  ;;  %v247_v33 = vmul.f32 0.0, %v246_v30 }
 0x19d   :  { %v250_v31 = vpop.permute.xlu0 %249 }
 0x19e   :  { %v252_v32 = vmul.f32 %v250_v31, %v246_v30 }
 0x1a0   :  { %254 = vrot.lane.b32.xlu0 %v252_v32, %s2683_s25 }
 0x212   :  { %v255_v34 = vpop.permute.xlu0 %254 }
 0x213   :  { %v257_v35 = vadd.f32 %v255_v34, %v247_v33 }
 0x215   :  { %2481 = vtanh.f32 %v257_v35 }
 0x21f   :  { %v2482_v36 = vpop.eup %2481 }
 0x220   :  { %260 = vrot.lane.b32.xlu1 %v2482_v36, %s2682_s3 }
 0x292   :  { %v261_v37 = vpop.permute.xlu1 %260 }
 0x293   :  { %v263_v38 = vmul.f32 %v261_v37, %v246_v30 }
 0x295   :  { %265 = vrot.lane.b32.xlu1 %v263_v38, %s2683_s25  ;;  %v582_v38 = vld [vmem:[#allocation2 + $0x8] sm:$0x3] }
 0x307   :  { %v266_v39 = vpop.permute.xlu1 %265 }
 0x308   :  { %269 = vst.msk [vmem:[#allocation3] sm:$0x3] %vm268_vm5, %v266_v39  ;;  %2173 = vmatmul.mubr.msk.f32.vlgmr.msra.gmra.mrb[2].mxu0 %vm164_vm6, %v266_v39 }
 0x309   :  { %2375 = vmatpush3.bf16.msra.mxu0 %v2772_v8  ;;  %2194 = vmatprep.mubr.msk.f32.mxu0 %vm2680_vm0, %v2681_v1 }
 0x30a   :  { %2376 = vmatprep.subr.bf16.mxu0 %v2679_v0 }
 0x30d   :  { %2378 = vmatpush3.bf16.msra.mxu0 %v2784_v12 }
 0x30e   :  { %2385 = vmatprep.subr.bf16.mxu0 %v2679_v0 }
 0x3db   :  { %v339_v41 = vpop.f32.mrb[2].mxu0 }
 0x3dc   :  { %v343_v42 = vadd.f32 %v339_v41, %v270_v40  ;;  %v2174_v43 = vpop.f32.mrb[3].mxu0 }
 0x3de   :  { %v2018_v44 = vmul.f32 -1.442695, %v343_v42 }
 0x3e0   :  { %2483 = vpow2.f32 %v2018_v44 }
 0x3e1   :  { %2485 = vtanh.f32 %v343_v42 }
 0x3ea   :  { %v2484_v45 = vpop.eup %2483 }
 0x3eb   :  { %v348_v46 = vadd.f32 1.0, %v2484_v45  ;;  %v2486_v47 = vpop.eup %2485 }
 0x3ed   :  { %2487 = vrcp.f32 %v348_v46 }
 0x3f7   :  { %v2488_v48 = vpop.eup %2487 }
 0x3f8   :  { %v351_v49 = vsel %vm2807_vm4, %v2486_v47, %v2488_v48 }
 0x3f9   :  { %354 = vrot.lane.b32.xlu0 %v351_v49, %s2682_s3  ;;  %v352_v52 = vmul.f32 %v351_v49, %v257_v35 }
 0x46b   :  { %v355_v50 = vpop.permute.xlu0 %354 }
 0x46c   :  { %v357_v51 = vmul.f32 %v355_v50, %v351_v49 }
 0x46e   :  { %359 = vrot.lane.b32.xlu1 %v357_v51, %s2683_s25 }
 0x4e0   :  { %v360_v53 = vpop.permute.xlu1 %359 }
 0x4e1   :  { %v362_v54 = vadd.f32 %v360_v53, %v352_v52 }
 0x4e3   :  { %2489 = vtanh.f32 %v362_v54 }
 0x4ed   :  { %v2490_v55 = vpop.eup %2489 }
 0x4ee   :  { %365 = vrot.lane.b32.xlu0 %v2490_v55, %s2682_s3 }
 0x560   :  { %v366_v56 = vpop.permute.xlu0 %365 }
 0x561   :  { %v368_v57 = vmul.f32 %v366_v56, %v351_v49 }
 0x563   :  { %370 = vrot.lane.b32.xlu1 %v368_v57, %s2683_s25  ;;  %v686_v57 = vld [vmem:[#allocation2 + $0xa] sm:$0x3] }
 0x5d5   :  { %v371_v58 = vpop.permute.xlu1 %370 }
 0x5d6   :  { %373 = vst.msk [vmem:[#allocation3 + $0x2] sm:$0x3] %vm268_vm5, %v371_v58  ;;  %2184 = vmatmul.mubr.msk.f32.vlgmr.msra.gmra.mrb[2].mxu1 %vm164_vm6, %v371_v58 }
 0x5d7   :  { %2381 = vmatpush3.bf16.msra.mxu1 %v2772_v8  ;;  %2205 = vmatprep.mubr.msk.f32.mxu1 %vm2680_vm0, %v2681_v1 }
 0x5d8   :  { %2382 = vmatprep.subr.bf16.mxu1 %v2679_v0 }
 0x5db   :  { %2384 = vmatpush3.bf16.msra.mxu1 %v2784_v12 }
 0x5dc   :  { %2391 = vmatprep.subr.bf16.mxu1 %v2679_v0 }
 0x6a9   :  { %v443_v60 = vpop.f32.mrb[2].mxu1 }
 0x6aa   :  { %v447_v61 = vadd.f32 %v443_v60, %v374_v59  ;;  %v2185_v62 = vpop.f32.mrb[3].mxu1 }
 0x6ac   :  { %v2020_v63 = vmul.f32 -1.442695, %v447_v61 }
 0x6ae   :  { %2491 = vpow2.f32 %v2020_v63 }
 0x6af   :  { %2493 = vtanh.f32 %v447_v61 }
 0x6b8   :  { %v2492_v2 = vpop.eup %2491 }
 0x6b9   :  { %v452_v3 = vadd.f32 1.0, %v2492_v2  ;;  %v2494_v4 = vpop.eup %2493 }
 0x6bb   :  { %2495 = vrcp.f32 %v452_v3 }
 0x6c5   :  { %v2496_v5 = vpop.eup %2495 }
 0x6c6   :  { %v455_v6 = vsel %vm2807_vm4, %v2494_v4, %v2496_v5 }
 0x6c7   :  { %458 = vrot.lane.b32.xlu0 %v455_v6, %s2682_s3  ;;  %v456_v10 = vmul.f32 %v455_v6, %v362_v54 }
 0x739   :  { %v459_v7 = vpop.permute.xlu0 %458 }
 0x73a   :  { %v461_v9 = vmul.f32 %v459_v7, %v455_v6 }
 0x73c   :  { %463 = vrot.lane.b32.xlu1 %v461_v9, %s2683_s25 }
 0x7ae   :  { %v464_v11 = vpop.permute.xlu1 %463 }
 0x7af   :  { %v466_v13 = vadd.f32 %v464_v11, %v456_v10 }
 0x7b1   :  { %2497 = vtanh.f32 %v466_v13 }
 0x7bb   :  { %v2498_v14 = vpop.eup %2497 }
 0x7bc   :  { %469 = vrot.lane.b32.xlu0 %v2498_v14, %s2682_s3 }
 0x82e   :  { %v470_v15 = vpop.permute.xlu0 %469 }
 0x82f   :  { %v472_v16 = vmul.f32 %v470_v15, %v455_v6  ;;  %v790_v15 = vld [vmem:[#allocation2 + $0xc] sm:$0x3] }
 0x831   :  { %474 = vrot.lane.b32.xlu1 %v472_v16, %s2683_s25 }
 0x8a3   :  { %v475_v17 = vpop.permute.xlu1 %474 }
 0x8a4   :  { %477 = vst.msk [vmem:[#allocation3 + $0x4] sm:$0x3] %vm268_vm5, %v475_v17  ;;  %2195 = vmatmul.mubr.msk.f32.vlgmr.msra.gmra.mrb[4].mxu0 %vm164_vm6, %v475_v17 }
 0x8a5   :  { %2387 = vmatpush3.bf16.msra.mxu0 %v2772_v8  ;;  %2216 = vmatprep.mubr.msk.f32.mxu0 %vm2680_vm0, %v2681_v1 }
 0x8a6   :  { %2388 = vmatprep.subr.bf16.mxu0 %v2679_v0 }
 0x8a9   :  { %2390 = vmatpush3.bf16.msra.mxu0 %v2784_v12 }
 0x8aa   :  { %2397 = vmatprep.subr.bf16.mxu0 %v2679_v0 }
 0x977   :  { %v547_v19 = vpop.f32.mrb[4].mxu0 }
 0x978   :  { %v551_v20 = vadd.f32 %v547_v19, %v478_v18  ;;  %v2196_v21 = vpop.f32.mrb[5].mxu0 }
 0x97a   :  { %v2022_v22 = vmul.f32 -1.442695, %v551_v20 }
 0x97c   :  { %2499 = vpow2.f32 %v2022_v22 }
 0x97d   :  { %2501 = vtanh.f32 %v551_v20 }
 0x986   :  { %v2500_v23 = vpop.eup %2499 }
 0x987   :  { %v556_v24 = vadd.f32 1.0, %v2500_v23  ;;  %v2502_v25 = vpop.eup %2501 }
 0x989   :  { %2503 = vrcp.f32 %v556_v24 }
 0x993   :  { %v2504_v26 = vpop.eup %2503 }
 0x994   :  { %v559_v28 = vsel %vm2807_vm4, %v2502_v25, %v2504_v26 }
 0x995   :  { %562 = vrot.lane.b32.xlu0 %v559_v28, %s2682_s3  ;;  %v560_v31 = vmul.f32 %v559_v28, %v466_v13 }
 0xa07   :  { %v563_v29 = vpop.permute.xlu0 %562 }
 0xa08   :  { %v565_v30 = vmul.f32 %v563_v29, %v559_v28 }
 0xa0a   :  { %567 = vrot.lane.b32.xlu1 %v565_v30, %s2683_s25 }
 0xa7c   :  { %v568_v32 = vpop.permute.xlu1 %567 }
 0xa7d   :  { %v570_v33 = vadd.f32 %v568_v32, %v560_v31 }
 0xa7f   :  { %2505 = vtanh.f32 %v570_v33 }
 0xa89   :  { %v2506_v34 = vpop.eup %2505 }
 0xa8a   :  { %573 = vrot.lane.b32.xlu0 %v2506_v34, %s2682_s3 }
 0xafc   :  { %v574_v35 = vpop.permute.xlu0 %573 }
 0xafd   :  { %v576_v36 = vmul.f32 %v574_v35, %v559_v28  ;;  %v894_v35 = vld [vmem:[#allocation2 + $0xe] sm:$0x3] }
 0xaff   :  { %578 = vrot.lane.b32.xlu1 %v576_v36, %s2683_s25 }
 0xb71   :  { %v579_v37 = vpop.permute.xlu1 %578 }
 0xb72   :  { %581 = vst.msk [vmem:[#allocation3 + $0x6] sm:$0x3] %vm268_vm5, %v579_v37  ;;  %2206 = vmatmul.mubr.msk.f32.vlgmr.msra.gmra.mrb[4].mxu1 %vm164_vm6, %v579_v37 }
 0xb73   :  { %2393 = vmatpush3.bf16.msra.mxu1 %v2772_v8  ;;  %2227 = vmatprep.mubr.msk.f32.mxu1 %vm2680_vm0, %v2681_v1 }
 0xb74   :  { %2394 = vmatprep.subr.bf16.mxu1 %v2679_v0 }
 0xb77   :  { %2396 = vmatpush3.bf16.msra.mxu1 %v2784_v12 }
 0xb79   :  { %v1007_v14 = vld [vmem:[#allocation3] sm:$0xff] }
 0xc45   :  { %v651_v39 = vpop.f32.mrb[4].mxu1 }
 0xc46   :  { %v655_v40 = vadd.f32 %v651_v39, %v582_v38  ;;  %v2207_v41 = vpop.f32.mrb[5].mxu1 }
 0xc48   :  { %v2024_v42 = vmul.f32 -1.442695, %v655_v40 }
 0xc4a   :  { %2507 = vpow2.f32 %v2024_v42 }
 0xc4b   :  { %2509 = vtanh.f32 %v655_v40 }
 0xc54   :  { %v2508_v43 = vpop.eup %2507 }
 0xc55   :  { %v660_v44 = vadd.f32 1.0, %v2508_v43  ;;  %v2510_v45 = vpop.eup %2509 }
 0xc57   :  { %2511 = vrcp.f32 %v660_v44 }
 0xc61   :  { %v2512_v46 = vpop.eup %2511 }
 0xc62   :  { %v663_v47 = vsel %vm2807_vm4, %v2510_v45, %v2512_v46 }
 0xc63   :  { %666 = vrot.lane.b32.xlu0 %v663_v47, %s2682_s3  ;;  %v664_v50 = vmul.f32 %v663_v47, %v570_v33 }
 0xcd5   :  { %v667_v48 = vpop.permute.xlu0 %666 }
 0xcd6   :  { %v669_v49 = vmul.f32 %v667_v48, %v663_v47 }
 0xcd8   :  { %671 = vrot.lane.b32.xlu1 %v669_v49, %s2683_s25 }
 0xd4a   :  { %v672_v51 = vpop.permute.xlu1 %671 }
 0xd4b   :  { %v674_v52 = vadd.f32 %v672_v51, %v664_v50  ;;  %v998_v51 = vld [vmem:[%s3072_s4] sm:$0xff] }
 0xd4d   :  { %2513 = vtanh.f32 %v674_v52 }
 0xd57   :  { %v2514_v53 = vpop.eup %2513 }
 0xd58   :  { %677 = vrot.lane.b32.xlu0 %v2514_v53, %s2682_s3 }
 0xdca   :  { %v678_v54 = vpop.permute.xlu0 %677 }
 0xdcb   :  { %v680_v55 = vmul.f32 %v678_v54, %v663_v47  ;;  %v1000_v54 = vld [vmem:[%s3072_s4 + $0x10] sm:$0xff] }
 0xdcd   :  { %682 = vrot.lane.b32.xlu1 %v680_v55, %s2683_s25  ;;  %v1001_v55 = vld [vmem:[%s3072_s4 + $0x18] sm:$0xff] }
 0xe3f   :  { %v683_v56 = vpop.permute.xlu1 %682 }
 0xe40   :  { %685 = vst.msk [vmem:[#allocation3 + $0x8] sm:$0x3] %vm268_vm5, %v683_v56  ;;  %2217 = vmatmul.mubr.msk.f32.vlgmr.msra.gmra.mrb[6].mxu0 %vm164_vm6, %v683_v56  ;;  %v2407_v56 = vpack.c.bf16 %v1001_v55, %v1000_v54 }
 0xe41   :  { %2399 = vmatpush3.bf16.msra.mxu0 %v2772_v8  ;;  %2238 = vmatprep.mubr.msk.f32.mxu0 %vm2680_vm0, %v2681_v1 }
 0xe42   :  { %2400 = vmatprep.subr.bf16.mxu0 %v2679_v0 }
 0xe45   :  { %2402 = vmatpush3.bf16.msra.mxu0 %v2784_v12 }
 0xe46   :  { %2411 = vmatprep.subr.bf16.mxu0 %v2679_v0 }
 0xf13   :  { %v755_v58 = vpop.f32.mrb[6].mxu0 }
 0xf14   :  { %v759_v59 = vadd.f32 %v755_v58, %v686_v57  ;;  %v2218_v60 = vpop.f32.mrb[7].mxu0  ;;  %v1002_v57 = vld [vmem:[%s3073_s5] sm:$0xff]  ;;  %v1003_v58 = vld [vmem:[%s3073_s5 + $0x8] sm:$0xff] }
 0xf15   :  { %v2926_v60 = vpack.c.bf16 %v1003_v58, %v1002_v57 }
 0xf16   :  { %v2026_v61 = vmul.f32 -1.442695, %v759_v59 }
 0xf18   :  { %2515 = vpow2.f32 %v2026_v61  ;;  %v1005_v61 = vld [vmem:[%s3073_s5 + $0x18] sm:$0xff] }
 0xf19   :  { %2517 = vtanh.f32 %v759_v59  ;;  %v1004_v59 = vld [vmem:[%s3073_s5 + $0x10] sm:$0xff] }
 0xf22   :  { %v2516_v62 = vpop.eup %2515 }
 0xf23   :  { %v764_v63 = vadd.f32 1.0, %v2516_v62  ;;  %v2518_v8 = vpop.eup %2517 }
 0xf25   :  { %2519 = vrcp.f32 %v764_v63 }
 0xf2f   :  { %v2520_v2 = vpop.eup %2519 }
 0xf30   :  { %v767_v3 = vsel %vm2807_vm4, %v2518_v8, %v2520_v2  ;;  %v2932_v8 = vpack.c.bf16 %v1005_v61, %v1004_v59 }
 0xf31   :  { %770 = vrot.lane.b32.xlu0 %v767_v3, %s2682_s3  ;;  %v768_v5 = vmul.f32 %v767_v3, %v674_v52  ;;  %v999_v52 = vld [vmem:[%s3072_s4 + $0x8] sm:$0xff] }
 0xf32   :  { %v2403_v53 = vpack.c.bf16 %v999_v52, %v998_v51 }
 0xf34   :  { %2404 = vmatprep.subr.bf16.mxu1 %v2403_v53 }
 0xfa3   :  { %v771_v12 = vpop.permute.xlu0 %770 }
 0xfa4   :  { %v773_v4 = vmul.f32 %v771_v12, %v767_v3 }
 0xfa6   :  { %775 = vrot.lane.b32.xlu1 %v773_v4, %s2683_s25 }
0x1018   :  { %v776_v6 = vpop.permute.xlu1 %775 }
0x1019   :  { %v778_v7 = vadd.f32 %v776_v6, %v768_v5  ;;  %v2031_v5 = vld [vmem:[%s3074_s6] ss:$0 sm:$0xff] }
0x101b   :  { %2521 = vtanh.f32 %v778_v7 }
0x1025   :  { %v2522_v9 = vpop.eup %2521 }
0x1026   :  { %781 = vrot.lane.b32.xlu0 %v2522_v9, %s2682_s3 }
0x1098   :  { %v782_v10 = vpop.permute.xlu0 %781 }
0x1099   :  { %v784_v11 = vmul.f32 %v782_v10, %v767_v3 }
0x109b   :  { %786 = vrot.lane.b32.xlu1 %v784_v11, %s2683_s25 }
0x110d   :  { %v787_v13 = vpop.permute.xlu1 %786 }
0x110e   :  { %789 = vst.msk [vmem:[#allocation3 + $0xa] sm:$0x3] %vm268_vm5, %v787_v13  ;;  %2228 = vmatmul.mubr.msk.f32.vlgmr.msra.gmra.mrb[6].mxu1 %vm164_vm6, %v787_v13 }
0x110f   :  { %2249 = vmatprep.mubr.msk.f32.mxu1 %vm164_vm6, %v1007_v14  ;;  %2406 = vmatpush3.bf16.msra.mxu1 %v2403_v53 }
0x1110   :  { %2408 = vmatprep.subr.bf16.mxu1 %v2407_v56 }
0x1113   :  { %2410 = vmatpush3.bf16.msra.mxu1 %v2407_v56 }
0x1114   :  { %2417 = vmatprep.subr.bf16.mxu1 %v2679_v0 }
0x11e1   :  { %v859_v16 = vpop.f32.mrb[6].mxu1 }
0x11e2   :  { %v863_v17 = vadd.f32 %v859_v16, %v790_v15  ;;  %v2229_v18 = vpop.f32.mrb[7].mxu1 }
0x11e4   :  { %v2028_v19 = vmul.f32 -1.442695, %v863_v17 }
0x11e6   :  { %2523 = vpow2.f32 %v2028_v19 }
0x11e7   :  { %2525 = vtanh.f32 %v863_v17 }
0x11f0   :  { %v2524_v20 = vpop.eup %2523 }
0x11f1   :  { %v868_v21 = vadd.f32 1.0, %v2524_v20  ;;  %v2526_v22 = vpop.eup %2525 }
0x11f3   :  { %2527 = vrcp.f32 %v868_v21 }
0x11fd   :  { %v2528_v23 = vpop.eup %2527 }
0x11fe   :  { %v871_v24 = vsel %vm2807_vm4, %v2526_v22, %v2528_v23 }
0x11ff   :  { %874 = vrot.lane.b32.xlu0 %v871_v24, %s2682_s3  ;;  %v872_v28 = vmul.f32 %v871_v24, %v778_v7 }
0x1271   :  { %v875_v25 = vpop.permute.xlu0 %874 }
0x1272   :  { %v877_v26 = vmul.f32 %v875_v25, %v871_v24 }
0x1274   :  { %879 = vrot.lane.b32.xlu1 %v877_v26, %s2683_s25 }
0x12e6   :  { %v880_v29 = vpop.permute.xlu1 %879 }
0x12e7   :  { %v882_v30 = vadd.f32 %v880_v29, %v872_v28 }
0x12e9   :  { %2529 = vtanh.f32 %v882_v30 }
0x12f3   :  { %v2530_v31 = vpop.eup %2529 }
0x12f4   :  { %885 = vrot.lane.b32.xlu0 %v2530_v31, %s2682_s3 }
0x1366   :  { %v886_v32 = vpop.permute.xlu0 %885 }
0x1367   :  { %v888_v33 = vmul.f32 %v886_v32, %v871_v24 }
0x1369   :  { %890 = vrot.lane.b32.xlu1 %v888_v33, %s2683_s25 }
0x13db   :  { %v891_v34 = vpop.permute.xlu1 %890 }
0x13dc   :  { %893 = vst.msk [vmem:[#allocation3 + $0xc] sm:$0x3] %vm268_vm5, %v891_v34  ;;  %2239 = vmatmul.mubr.msk.f32.vlgmr.msra.gmra.mrb[8].mxu0 %vm164_vm6, %v891_v34 }
0x13dd   :  { %2260 = vmatprep.mubr.msk.f32.mxu0 %vm2680_vm0, %v2681_v1  ;;  %2413 = vmatpush3.bf16.msra.mxu0 %v2926_v60 }
0x13de   :  { %2414 = vmatprep.subr.bf16.mxu0 %v2679_v0 }
0x13e1   :  { %2416 = vmatpush3.bf16.msra.mxu0 %v2932_v8 }
0x13e2   :  { %2423 = vmatprep.subr.bf16.mxu0 %v2679_v0 }
0x13e4   :  { %2261 = vmatmul.mubr.f32.vlgmr.msra.gmra.mrb[10].mxu0 %v2681_v1 }
0x13e5   :  { %2425 = vmatpush3.bf16.msra.mxu0 %v2926_v60  ;;  %2282 = vmatprep.mubr.msk.f32.mxu0 %vm2680_vm0, %v2681_v1 }
0x13e6   :  { %2426 = vmatprep.subr.bf16.mxu0 %v2679_v0 }
0x13e9   :  { %2428 = vmatpush3.bf16.msra.mxu0 %v2932_v8 }
0x13ea   :  { %2435 = vmatprep.subr.bf16.mxu0 %v2679_v0 }
0x14af   :  { %v963_v36 = vpop.f32.mrb[8].mxu0 }
0x14b0   :  { %v967_v37 = vadd.f32 %v963_v36, %v894_v35  ;;  %v2240_v38 = vpop.f32.mrb[9].mxu0 }
0x14b2   :  { %v2030_v39 = vmul.f32 -1.442695, %v967_v37 }
0x14b4   :  { %2531 = vpow2.f32 %v2030_v39 }
0x14b5   :  { %2533 = vtanh.f32 %v967_v37 }
0x14b7   :  { %v1165_v12 = vpop.f32.mrb[10].mxu0 }
0x14b8   :  { %v2262_v4 = vpop.f32.mrb[11].mxu0 }
0x14be   :  { %v2532_v40 = vpop.eup %2531 }
0x14bf   :  { %v972_v41 = vadd.f32 1.0, %v2532_v40  ;;  %v2534_v42 = vpop.eup %2533 }
0x14c1   :  { %2535 = vrcp.f32 %v972_v41 }
0x14cb   :  { %v2536_v43 = vpop.eup %2535 }
0x14cc   :  { %v975_v44 = vsel %vm2807_vm4, %v2534_v42, %v2536_v43 }
0x14cd   :  { %978 = vrot.lane.b32.xlu0 %v975_v44, %s2682_s3  ;;  %v976_v47 = vmul.f32 %v975_v44, %v882_v30 }
0x153f   :  { %v979_v45 = vpop.permute.xlu0 %978 }
0x1540   :  { %v981_v46 = vmul.f32 %v979_v45, %v975_v44 }
0x1542   :  { %983 = vrot.lane.b32.xlu1 %v981_v46, %s2683_s25 }
0x15b4   :  { %v984_v48 = vpop.permute.xlu1 %983 }
0x15b5   :  { %v986_v49 = vadd.f32 %v984_v48, %v976_v47 }
0x15b7   :  { %2537 = vtanh.f32 %v986_v49 }
0x15c1   :  { %v2538_v50 = vpop.eup %2537 }
0x15c2   :  { %989 = vrot.lane.b32.xlu0 %v2538_v50, %s2682_s3 }
0x1634   :  { %v990_v62 = vpop.permute.xlu0 %989 }
0x1635   :  { %v992_v63 = vmul.f32 %v990_v62, %v975_v44 }
0x1637   :  { %994 = vrot.lane.b32.xlu1 %v992_v63, %s2683_s25 }
0x16a9   :  { %v995_v2 = vpop.permute.xlu1 %994 }
0x16aa   :  { %997 = vst.msk [vmem:[#allocation3 + $0xe] sm:$0x3] %vm268_vm5, %v995_v2 }
0x16b1   :  { %v1008_v3 = vld [vmem:[#allocation3 + $0x8] sm:$0xff] }
0x16b2   :  { %2250 = vmatmul.mubr.msk.f32.vlgmr.msra.gmra.mrb[8].mxu1 %vm164_vm6, %v1008_v3 }
0x16b3   :  { %2419 = vmatpush3.bf16.msra.mxu1 %v2926_v60  ;;  %2271 = vmatprep.mubr.msk.f32.mxu1 %vm2680_vm0, %v2681_v1 }
0x16b4   :  { %2420 = vmatprep.subr.bf16.mxu1 %v2679_v0 }
0x16b7   :  { %2422 = vmatpush3.bf16.msra.mxu1 %v2932_v8 }
0x16b8   :  { %2429 = vmatprep.subr.bf16.mxu1 %v2679_v0 }
0x1785   :  { %v2251_v6 = vpop.f32.mrb[8].mxu1 }
0x1786   :  { %v1093_v7 = vadd.f32 %v2251_v6, %v2031_v5  ;;  %v1087_v9 = vpop.f32.mrb[9].mxu1 }
0x1787   :  { %v1088_v10 = vadd.f32 %v2031_v5, %v1087_v9 }
0x1788   :  { %1097 = vst [vmem:[#allocation2 + $0x8] sm:$0xff] %v1093_v7 }
0x1789   :  { %1096 = vst [vmem:[#allocation2] sm:$0xff] %v1088_v10 }
0x1790   :  { %v1098_v11 = vld [vmem:[#allocation2] sm:$0x3]  ;;  %v1195_v30 = vld [vmem:[#allocation2 + $0x2] sm:$0x3]  ;;  %v1297_v49 = vld [vmem:[#allocation2 + $0x4] sm:$0x3] }
0x1791   :  { %v1169_v13 = vadd.f32 %v1165_v12, %v1098_v11  ;;  %v1399_v6 = vld [vmem:[#allocation2 + $0x6] sm:$0x3] }
0x1793   :  { %v2034_v14 = vmul.f32 -1.442695, %v1169_v13 }
0x1795   :  { %2539 = vpow2.f32 %v2034_v14 }
0x1796   :  { %2541 = vtanh.f32 %v1169_v13 }
0x179f   :  { %v2540_v15 = vpop.eup %2539 }
0x17a0   :  { %v1174_v16 = vadd.f32 1.0, %v2540_v15  ;;  %v2542_v17 = vpop.eup %2541 }
0x17a2   :  { %2543 = vrcp.f32 %v1174_v16 }
0x17ac   :  { %v2544_v18 = vpop.eup %2543 }
0x17ad   :  { %v1177_v19 = vsel %vm2807_vm4, %v2542_v17, %v2544_v18 }
0x17ae   :  { %1180 = vrot.lane.b32.xlu0 %v1177_v19, %s2682_s3  ;;  %v1178_v22 = vmul.f32 0.0, %v1177_v19 }
0x1820   :  { %v1181_v20 = vpop.permute.xlu0 %1180 }
0x1821   :  { %v1183_v21 = vmul.f32 %v1181_v20, %v1177_v19 }
0x1823   :  { %1185 = vrot.lane.b32.xlu1 %v1183_v21, %s2683_s25 }
0x1895   :  { %v1186_v23 = vpop.permute.xlu1 %1185 }
0x1896   :  { %v1188_v24 = vadd.f32 %v1186_v23, %v1178_v22 }
0x1898   :  { %2545 = vtanh.f32 %v1188_v24 }
0x18a2   :  { %v2546_v25 = vpop.eup %2545 }
0x18a3   :  { %1191 = vrot.lane.b32.xlu0 %v2546_v25, %s2682_s3 }
0x1915   :  { %v1192_v26 = vpop.permute.xlu0 %1191 }
0x1916   :  { %v1194_v28 = vmul.f32 %v1192_v26, %v1177_v19 }
0x1918   :  { %1197 = vrot.lane.b32.xlu1 %v1194_v28, %s2683_s25  ;;  %v1501_v28 = vld [vmem:[#allocation2 + $0x8] sm:$0x3] }
0x198a   :  { %v1198_v29 = vpop.permute.xlu1 %1197 }
0x198b   :  { %2272 = vmatmul.mubr.msk.f32.vlgmr.msra.gmra.mrb[10].mxu1 %vm164_vm6, %v1198_v29 }
0x198c   :  { %2431 = vmatpush3.bf16.msra.mxu1 %v2926_v60  ;;  %2293 = vmatprep.mubr.msk.f32.mxu1 %vm2680_vm0, %v2681_v1 }
0x198d   :  { %2432 = vmatprep.subr.bf16.mxu1 %v2679_v0 }
0x1990   :  { %2434 = vmatpush3.bf16.msra.mxu1 %v2932_v8 }
0x1991   :  { %2441 = vmatprep.subr.bf16.mxu1 %v2679_v0 }
0x1a5e   :  { %v1267_v31 = vpop.f32.mrb[10].mxu1 }
0x1a5f   :  { %v1271_v32 = vadd.f32 %v1267_v31, %v1195_v30  ;;  %v2273_v33 = vpop.f32.mrb[11].mxu1 }
0x1a61   :  { %v2036_v34 = vmul.f32 -1.442695, %v1271_v32 }
0x1a63   :  { %2547 = vpow2.f32 %v2036_v34 }
0x1a64   :  { %2549 = vtanh.f32 %v1271_v32 }
0x1a6d   :  { %v2548_v35 = vpop.eup %2547 }
0x1a6e   :  { %v1276_v36 = vadd.f32 1.0, %v2548_v35  ;;  %v2550_v37 = vpop.eup %2549 }
0x1a70   :  { %2551 = vrcp.f32 %v1276_v36 }
0x1a7a   :  { %v2552_v38 = vpop.eup %2551 }
0x1a7b   :  { %v1279_v39 = vsel %vm2807_vm4, %v2550_v37, %v2552_v38 }
0x1a7c   :  { %1282 = vrot.lane.b32.xlu0 %v1279_v39, %s2682_s3  ;;  %v1280_v42 = vmul.f32 %v1279_v39, %v1188_v24 }
0x1aee   :  { %v1283_v40 = vpop.permute.xlu0 %1282 }
0x1aef   :  { %v1285_v41 = vmul.f32 %v1283_v40, %v1279_v39 }
0x1af1   :  { %1287 = vrot.lane.b32.xlu1 %v1285_v41, %s2683_s25 }
0x1b63   :  { %v1288_v43 = vpop.permute.xlu1 %1287 }
0x1b64   :  { %v1290_v44 = vadd.f32 %v1288_v43, %v1280_v42 }
0x1b66   :  { %2553 = vtanh.f32 %v1290_v44 }
0x1b70   :  { %v2554_v45 = vpop.eup %2553 }
0x1b71   :  { %1293 = vrot.lane.b32.xlu0 %v2554_v45, %s2682_s3 }
0x1be3   :  { %v1294_v46 = vpop.permute.xlu0 %1293 }
0x1be4   :  { %v1296_v47 = vmul.f32 %v1294_v46, %v1279_v39 }
0x1be6   :  { %1299 = vrot.lane.b32.xlu1 %v1296_v47, %s2683_s25  ;;  %v1603_v47 = vld [vmem:[#allocation2 + $0xa] sm:$0x3] }
0x1c58   :  { %v1300_v48 = vpop.permute.xlu1 %1299 }
0x1c59   :  { %2283 = vmatmul.mubr.msk.f32.vlgmr.msra.gmra.mrb[12].mxu0 %vm164_vm6, %v1300_v48 }
0x1c5a   :  { %2437 = vmatpush3.bf16.msra.mxu0 %v2926_v60  ;;  %2304 = vmatprep.mubr.msk.f32.mxu0 %vm2680_vm0, %v2681_v1 }
0x1c5b   :  { %2438 = vmatprep.subr.bf16.mxu0 %v2679_v0 }
0x1c5e   :  { %2440 = vmatpush3.bf16.msra.mxu0 %v2932_v8 }
0x1c5f   :  { %2447 = vmatprep.subr.bf16.mxu0 %v2679_v0 }
0x1d2c   :  { %v1369_v50 = vpop.f32.mrb[12].mxu0 }
0x1d2d   :  { %v1373_v51 = vadd.f32 %v1369_v50, %v1297_v49  ;;  %v2284_v52 = vpop.f32.mrb[13].mxu0 }
0x1d2f   :  { %v2038_v53 = vmul.f32 -1.442695, %v1373_v51 }
0x1d31   :  { %2555 = vpow2.f32 %v2038_v53 }
0x1d32   :  { %2557 = vtanh.f32 %v1373_v51 }
0x1d3b   :  { %v2556_v54 = vpop.eup %2555 }
0x1d3c   :  { %v1378_v55 = vadd.f32 1.0, %v2556_v54  ;;  %v2558_v56 = vpop.eup %2557 }
0x1d3e   :  { %2559 = vrcp.f32 %v1378_v55 }
0x1d48   :  { %v2560_v57 = vpop.eup %2559 }
0x1d49   :  { %v1381_v58 = vsel %vm2807_vm4, %v2558_v56, %v2560_v57 }
0x1d4a   :  { %1384 = vrot.lane.b32.xlu0 %v1381_v58, %s2682_s3  ;;  %v1382_v62 = vmul.f32 %v1381_v58, %v1290_v44 }
0x1dbc   :  { %v1385_v59 = vpop.permute.xlu0 %1384 }
0x1dbd   :  { %v1387_v61 = vmul.f32 %v1385_v59, %v1381_v58 }
0x1dbf   :  { %1389 = vrot.lane.b32.xlu1 %v1387_v61, %s2683_s25 }
0x1e31   :  { %v1390_v63 = vpop.permute.xlu1 %1389 }
0x1e32   :  { %v1392_v2 = vadd.f32 %v1390_v63, %v1382_v62 }
0x1e34   :  { %2561 = vtanh.f32 %v1392_v2 }
0x1e3e   :  { %v2562_v3 = vpop.eup %2561 }
0x1e3f   :  { %1395 = vrot.lane.b32.xlu0 %v2562_v3, %s2682_s3  ;;  %v1705_v3 = vld [vmem:[#allocation2 + $0xc] sm:$0x3] }
0x1eb1   :  { %v1396_v12 = vpop.permute.xlu0 %1395 }
0x1eb2   :  { %v1398_v4 = vmul.f32 %v1396_v12, %v1381_v58 }
0x1eb4   :  { %1401 = vrot.lane.b32.xlu1 %v1398_v4, %s2683_s25 }
0x1f26   :  { %v1402_v5 = vpop.permute.xlu1 %1401 }
0x1f27   :  { %2294 = vmatmul.mubr.msk.f32.vlgmr.msra.gmra.mrb[12].mxu1 %vm164_vm6, %v1402_v5 }
0x1f28   :  { %2443 = vmatpush3.bf16.msra.mxu1 %v2926_v60  ;;  %2315 = vmatprep.mubr.msk.f32.mxu1 %vm2680_vm0, %v2681_v1 }
0x1f29   :  { %2444 = vmatprep.subr.bf16.mxu1 %v2679_v0 }
0x1f2c   :  { %2446 = vmatpush3.bf16.msra.mxu1 %v2932_v8 }
0x1f2d   :  { %2453 = vmatprep.subr.bf16.mxu1 %v2679_v0 }
0x1ffa   :  { %v1471_v7 = vpop.f32.mrb[12].mxu1 }
0x1ffb   :  { %v1475_v9 = vadd.f32 %v1471_v7, %v1399_v6  ;;  %v2295_v10 = vpop.f32.mrb[13].mxu1 }
0x1ffd   :  { %v2040_v11 = vmul.f32 -1.442695, %v1475_v9 }
0x1fff   :  { %2563 = vpow2.f32 %v2040_v11 }
0x2000   :  { %2565 = vtanh.f32 %v1475_v9 }
0x2009   :  { %v2564_v13 = vpop.eup %2563 }
0x200a   :  { %v1480_v14 = vadd.f32 1.0, %v2564_v13  ;;  %v2566_v15 = vpop.eup %2565 }
0x200c   :  { %2567 = vrcp.f32 %v1480_v14 }
0x2016   :  { %v2568_v16 = vpop.eup %2567 }
0x2017   :  { %v1483_v17 = vsel %vm2807_vm4, %v2566_v15, %v2568_v16 }
0x2018   :  { %1486 = vrot.lane.b32.xlu0 %v1483_v17, %s2682_s3  ;;  %v1484_v20 = vmul.f32 %v1483_v17, %v1392_v2 }
0x208a   :  { %v1487_v18 = vpop.permute.xlu0 %1486 }
0x208b   :  { %v1489_v19 = vmul.f32 %v1487_v18, %v1483_v17 }
0x208d   :  { %1491 = vrot.lane.b32.xlu1 %v1489_v19, %s2683_s25 }
0x20ff   :  { %v1492_v21 = vpop.permute.xlu1 %1491 }
0x2100   :  { %v1494_v22 = vadd.f32 %v1492_v21, %v1484_v20 }
0x2102   :  { %2569 = vtanh.f32 %v1494_v22 }
0x210c   :  { %v2570_v23 = vpop.eup %2569 }
0x210d   :  { %1497 = vrot.lane.b32.xlu0 %v2570_v23, %s2682_s3 }
0x217f   :  { %v1498_v24 = vpop.permute.xlu0 %1497 }
0x2180   :  { %v1500_v25 = vmul.f32 %v1498_v24, %v1483_v17 }
0x2182   :  { %1503 = vrot.lane.b32.xlu1 %v1500_v25, %s2683_s25 }
0x21f4   :  { %v1504_v26 = vpop.permute.xlu1 %1503 }
0x21f5   :  { %2305 = vmatmul.mubr.msk.f32.vlgmr.msra.gmra.mrb[14].mxu0 %vm164_vm6, %v1504_v26 }
0x21f6   :  { %2449 = vmatpush3.bf16.msra.mxu0 %v2926_v60  ;;  %2326 = vmatprep.mubr.msk.f32.mxu0 %vm2680_vm0, %v2681_v1 }
0x21f7   :  { %2450 = vmatprep.subr.bf16.mxu0 %v2679_v0 }
0x21fa   :  { %2452 = vmatpush3.bf16.msra.mxu0 %v2932_v8 }
0x21fb   :  { %2459 = vmatprep.subr.bf16.mxu0 %v2679_v0 }
0x22c8   :  { %v1573_v29 = vpop.f32.mrb[14].mxu0 }
0x22c9   :  { %v1577_v30 = vadd.f32 %v1573_v29, %v1501_v28  ;;  %v2306_v31 = vpop.f32.mrb[15].mxu0 }
0x22cb   :  { %v2042_v32 = vmul.f32 -1.442695, %v1577_v30 }
0x22cd   :  { %2571 = vpow2.f32 %v2042_v32 }
0x22ce   :  { %2573 = vtanh.f32 %v1577_v30 }
0x22d7   :  { %v2572_v33 = vpop.eup %2571 }
0x22d8   :  { %v1582_v34 = vadd.f32 1.0, %v2572_v33  ;;  %v2574_v35 = vpop.eup %2573 }
0x22da   :  { %2575 = vrcp.f32 %v1582_v34 }
0x22e4   :  { %v2576_v36 = vpop.eup %2575 }
0x22e5   :  { %v1585_v37 = vsel %vm2807_vm4, %v2574_v35, %v2576_v36 }
0x22e6   :  { %1588 = vrot.lane.b32.xlu0 %v1585_v37, %s2682_s3  ;;  %v1586_v40 = vmul.f32 %v1585_v37, %v1494_v22  ;;  %v1807_v22 = vld [vmem:[#allocation2 + $0xe] sm:$0x3] }
0x2358   :  { %v1589_v38 = vpop.permute.xlu0 %1588 }
0x2359   :  { %v1591_v39 = vmul.f32 %v1589_v38, %v1585_v37  ;;  %v1909_v38 = vld [vmem:[%s3075_s7] sm:$0xff] }
0x235b   :  { %1593 = vrot.lane.b32.xlu1 %v1591_v39, %s2683_s25  ;;  %v1910_v39 = vld [vmem:[%s3075_s7 + $0x8] sm:$0xff] }
0x23cd   :  { %v1594_v41 = vpop.permute.xlu1 %1593 }
0x23ce   :  { %v1596_v42 = vadd.f32 %v1594_v41, %v1586_v40  ;;  %v2460_v40 = vpack.c.bf16 %v1910_v39, %v1909_v38  ;;  %v1912_v41 = vld [vmem:[%s3075_s7 + $0x18] sm:$0xff]  ;;  %s2647_s7 = scalar_lea.vmem %s2004_s26, 32 }
0x23cf   :  { %p2648_p2 = scmp.ne.s32.totalorder %s2004_s26, %s2647_s7  ;;  %p2653_p4 = scmp.lt.s32.totalorder %s2647_s7, %s2647_s7 }
0x23d0   :  { %2577 = vtanh.f32 %v1596_v42 }
0x23d1   :  { %p2654_p5 = por %p2653_p4, %p2652_p3 }
0x23d3   :  { %p2655_p6 = pnand %p2654_p5, %p2648_p2 }
0x23da   :  { %v2578_v43 = vpop.eup %2577 }
0x23db   :  { %1599 = vrot.lane.b32.xlu0 %v2578_v43, %s2682_s3 }
0x244d   :  { %v1600_v44 = vpop.permute.xlu0 %1599 }
0x244e   :  { %v1602_v45 = vmul.f32 %v1600_v44, %v1585_v37 }
0x2450   :  { %1605 = vrot.lane.b32.xlu1 %v1602_v45, %s2683_s25 }
0x24c2   :  { %v1606_v46 = vpop.permute.xlu1 %1605 }
0x24c3   :  { %2316 = vmatmul.mubr.msk.f32.vlgmr.msra.gmra.mrb[14].mxu1 %vm164_vm6, %v1606_v46 }
0x24c4   :  { %2455 = vmatpush3.bf16.msra.mxu1 %v2926_v60  ;;  %2337 = vmatprep.mubr.msk.f32.mxu1 %vm2680_vm0, %v2681_v1 }
0x24c5   :  { %2456 = vmatprep.subr.bf16.mxu1 %v2679_v0 }
0x24c8   :  { %2458 = vmatpush3.bf16.msra.mxu1 %v2932_v8 }
0x2596   :  { %v1675_v48 = vpop.f32.mrb[14].mxu1 }
0x2597   :  { %v1679_v49 = vadd.f32 %v1675_v48, %v1603_v47  ;;  %v2317_v50 = vpop.f32.mrb[15].mxu1  ;;  %v2049_v47 = vld [vmem:[#allocation7] ss:$0 sm:$0xff] }
0x2599   :  { %v2044_v51 = vmul.f32 -1.442695, %v1679_v49 }
0x259b   :  { %2579 = vpow2.f32 %v2044_v51 }
0x259c   :  { %2581 = vtanh.f32 %v1679_v49 }
0x25a5   :  { %v2580_v52 = vpop.eup %2579 }
0x25a6   :  { %v1684_v53 = vadd.f32 1.0, %v2580_v52  ;;  %v2582_v54 = vpop.eup %2581 }
0x25a8   :  { %2583 = vrcp.f32 %v1684_v53 }
0x25b2   :  { %v2584_v55 = vpop.eup %2583 }
0x25b3   :  { %v1687_v60 = vsel %vm2807_vm4, %v2582_v54, %v2584_v55 }
0x25b4   :  { %1690 = vrot.lane.b32.xlu0 %v1687_v60, %s2682_s3  ;;  %v1688_v8 = vmul.f32 %v1687_v60, %v1596_v42  ;;  %v2463_v42 = vpack.c.bf16 %v1912_v41, %v1911_v27 }
0x2626   :  { %v1691_v56 = vpop.permute.xlu0 %1690 }
0x2627   :  { %v1693_v57 = vmul.f32 %v1691_v56, %v1687_v60 }
0x2629   :  { %1695 = vrot.lane.b32.xlu1 %v1693_v57, %s2683_s25 }
0x269b   :  { %v1696_v58 = vpop.permute.xlu1 %1695 }
0x269c   :  { %v1698_v59 = vadd.f32 %v1696_v58, %v1688_v8 }
0x269e   :  { %2585 = vtanh.f32 %v1698_v59 }
0x26a8   :  { %v2586_v61 = vpop.eup %2585 }
0x26a9   :  { %1701 = vrot.lane.b32.xlu0 %v2586_v61, %s2682_s3 }
0x271b   :  { %v1702_v62 = vpop.permute.xlu0 %1701 }
0x271c   :  { %v1704_v63 = vmul.f32 %v1702_v62, %v1687_v60 }
0x271e   :  { %1707 = vrot.lane.b32.xlu1 %v1704_v63, %s2683_s25 }
0x2790   :  { %v1708_v2 = vpop.permute.xlu1 %1707 }
0x2791   :  { %2327 = vmatmul.mubr.msk.f32.vlgmr.msra.gmra.mrb[16].mxu0 %vm164_vm6, %v1708_v2 }
0x2792   :  { %2348 = vmatprep.mubr.msk.f32.mxu0 %vm2680_vm0, %v2681_v1  ;;  %2461 = vmatpush3.bf16.msra.mxu0 %v2460_v40 }
0x2793   :  { %2462 = vmatprep.subr.bf16.mxu0 %v2679_v0 }
0x2796   :  { %2464 = vmatpush3.bf16.msra.mxu0 %v2463_v42 }
0x2864   :  { %v1777_v12 = vpop.f32.mrb[16].mxu0 }
0x2865   :  { %v1781_v4 = vadd.f32 %v1777_v12, %v1705_v3  ;;  %v2328_v5 = vpop.f32.mrb[17].mxu0 }
0x2867   :  { %v2046_v6 = vmul.f32 -1.442695, %v1781_v4 }
0x2869   :  { %2587 = vpow2.f32 %v2046_v6 }
0x286a   :  { %2589 = vtanh.f32 %v1781_v4 }
0x2873   :  { %v2588_v7 = vpop.eup %2587 }
0x2874   :  { %v1786_v9 = vadd.f32 1.0, %v2588_v7  ;;  %v2590_v10 = vpop.eup %2589 }
0x2876   :  { %2591 = vrcp.f32 %v1786_v9 }
0x2880   :  { %v2592_v11 = vpop.eup %2591 }
0x2881   :  { %v1789_v13 = vsel %vm2807_vm4, %v2590_v10, %v2592_v11 }
0x2882   :  { %1792 = vrot.lane.b32.xlu0 %v1789_v13, %s2682_s3  ;;  %v1790_v1 = vmul.f32 %v1789_v13, %v1698_v59 }
0x28f4   :  { %v1793_v14 = vpop.permute.xlu0 %1792 }
0x28f5   :  { %v1795_v15 = vmul.f32 %v1793_v14, %v1789_v13 }
0x28f7   :  { %1797 = vrot.lane.b32.xlu1 %v1795_v15, %s2683_s25 }
0x2969   :  { %v1798_v16 = vpop.permute.xlu1 %1797 }
0x296a   :  { %v1800_v17 = vadd.f32 %v1798_v16, %v1790_v1 }
0x296c   :  { %2593 = vtanh.f32 %v1800_v17 }
0x2976   :  { %v2594_v18 = vpop.eup %2593 }
0x2977   :  { %1803 = vrot.lane.b32.xlu0 %v2594_v18, %s2682_s3 }
0x29e9   :  { %v1804_v19 = vpop.permute.xlu0 %1803 }
0x29ea   :  { %v1806_v20 = vmul.f32 %v1804_v19, %v1789_v13 }
0x29ec   :  { %1809 = vrot.lane.b32.xlu1 %v1806_v20, %s2683_s25 }
0x2a5e   :  { %v1810_v21 = vpop.permute.xlu1 %1809 }
0x2a5f   :  { %2338 = vmatmul.mubr.msk.f32.vlgmr.msra.gmra.mrb[16].mxu1 %vm164_vm6, %v1810_v21 }
0x2b32   :  { %v1879_v23 = vpop.f32.mrb[16].mxu1 }
0x2b33   :  { %v1883_v24 = vadd.f32 %v1879_v23, %v1807_v22  ;;  %v2339_v25 = vpop.f32.mrb[17].mxu1 }
0x2b35   :  { %v2048_v26 = vmul.f32 -1.442695, %v1883_v24 }
0x2b37   :  { %2595 = vpow2.f32 %v2048_v26 }
0x2b38   :  { %2597 = vtanh.f32 %v1883_v24 }
0x2b41   :  { %v2596_v28 = vpop.eup %2595 }
0x2b42   :  { %v1888_v29 = vadd.f32 1.0, %v2596_v28  ;;  %v2598_v30 = vpop.eup %2597 }
0x2b44   :  { %2599 = vrcp.f32 %v1888_v29 }
0x2b4e   :  { %v2600_v31 = vpop.eup %2599 }
0x2b4f   :  { %v1891_v32 = vsel %vm2807_vm4, %v2598_v30, %v2600_v31 }
0x2b50   :  { %1894 = vrot.lane.b32.xlu0 %v1891_v32, %s2682_s3  ;;  %v1892_v35 = vmul.f32 %v1891_v32, %v1800_v17 }
0x2bc2   :  { %v1895_v33 = vpop.permute.xlu0 %1894 }
0x2bc3   :  { %v1897_v34 = vmul.f32 %v1895_v33, %v1891_v32 }
0x2bc5   :  { %1899 = vrot.lane.b32.xlu1 %v1897_v34, %s2683_s25 }
0x2c37   :  { %v1900_v36 = vpop.permute.xlu1 %1899 }
0x2c38   :  { %v1902_v37 = vadd.f32 %v1900_v36, %v1892_v35 }
0x2c3a   :  { %2601 = vtanh.f32 %v1902_v37 }
0x2c44   :  { %v2602_v43 = vpop.eup %2601 }
0x2c45   :  { %1905 = vrot.lane.b32.xlu0 %v2602_v43, %s2682_s3 }
0x2cb7   :  { %v1906_v44 = vpop.permute.xlu0 %1905 }
0x2cb8   :  { %v1908_v45 = vmul.f32 %v1906_v44, %v1891_v32 }
0x2cba   :  { %1921 = vrot.lane.b32.xlu1 %v1908_v45, %s2683_s25 }
0x2d2c   :  { %v1922_v46 = vpop.permute.xlu1 %1921 }
0x2d2d   :  { %2349 = vmatmul.mubr.msk.f32.vlgmr.msra.gmra.mrb[18].mxu0 %vm164_vm6, %v1922_v46 }
0x2e00   :  { %v1991_v48 = vpop.f32.mrb[18].mxu0 }
0x2e01   :  { %v1992_v49 = vadd.f32 %v2049_v47, %v1991_v48  ;;  %v2350_v50 = vpop.f32.mrb[19].mxu0 }
0x2e03   :  { %1996 = vst.msk [vmem:[#allocation9] sm:$0x3] %vm1995_vm7, %v1992_v49 }
0x2e04   :  { %2658 = shalt.err (!%p2655_p6)
}
0x2e05   :  { %s2659_s27 = scalar_lea.hbm %s3077_s9, 32 }
0x2e06   :  { %p2660_p7 = scmp.ne.s32.totalorder %s3077_s9, %s2659_s27  ;;  %p2663_p8 = scmp.lt.u32.totalorder %s2659_s27, %s3077_s9 }
0x2e08   :  { %p2665_p9 = pnand %p2663_p8, %p2660_p7 }
0x2e0a   :  { %2668 = shalt.err (!%p2665_p9)
}
0x2e0b   :  { %2006 = dma.vmem_to_hbm [thread:$0]  %s2004_s26, 32, %s3077_s9, [#allocation6]  }
0x2e0c   :  { %2673 = dma.done.wait [#allocation6], 32  }
0x2e0d   :  { %2674 = vsyncadd [#allocation6], 4294967264 }
0x2e0e   :  { %2010 = vsyncpa [#allocation5], 1 }
0x2e0f   :  { %2011 = vsyncpa [#allocation8], 1 }
0x2e10   :  { %2012 = vsyncpa [#allocation6], 1 }

</bundles_post_ra>
